<compile_context>
chip_gen: v5e
topology: v5e:2x2
jax: 0.10.0
libtpu: 0.0.40
codegen_flags: <defaults>
</compile_context>

<pallas_src>
import functools

import jax
import jax.numpy as jnp
from jax import lax
from jax.experimental import pallas as pl
from jax.experimental.pallas import tpu as pltpu


VMEM_LIMIT = 32 * 1024 * 1024        # scoped-VMEM cap: safe on v5e/v6e/v7x
RESIDENT_B_BYTES = 6 * 1024 * 1024   # keep the whole weight in VMEM below this
A_BLOCK_BYTES = 4 * 1024 * 1024      # per-step A block budget (bf16)


# ----------------------------------------------------------------------------
# MXU matmul, resident-weight path: one K pass, weight fetched once,
# fused bias / residual / ReLU epilogue.
# ----------------------------------------------------------------------------
def _mm_resident_kernel(*refs, apply_relu, has_bias, has_res):
    a_ref, b_ref = refs[0], refs[1]
    idx = 2
    bias_ref = res_ref = None
    if has_bias:
        bias_ref = refs[idx]
        idx += 1
    if has_res:
        res_ref = refs[idx]
        idx += 1
    o_ref = refs[idx]

    r = jnp.dot(a_ref[...], b_ref[...], preferred_element_type=jnp.float32)
    if has_bias:
        r = r + bias_ref[...]
    if has_res:
        r = r + res_ref[...].astype(jnp.float32)
    if apply_relu:
        r = jnp.maximum(r, 0.0)
    o_ref[...] = r.astype(o_ref.dtype)


def _round_up(x, m):
    return (x + m - 1) // m * m


def _choose_tile(dim, cap, align):
    """Return (tile, padded_dim).  Prefers full-dim blocks (no padding)."""
    if dim <= cap:
        return dim, dim
    t = (cap // align) * align
    while t >= align:
        if dim % t == 0:
            return t, dim
        t -= align
    t = (cap // align) * align
    return t, _round_up(dim, t)


def _matmul_resident(a, b, bias, residual, relu, out_dtype, cap_m):
    M, K = a.shape
    _, N = b.shape
    # keep the per-step (tm, K) bf16 A block under A_BLOCK_BYTES
    cap_m_eff = min(cap_m, max(16, A_BLOCK_BYTES // max(1, K * 2)))
    cap_m_eff = max(16, (cap_m_eff // 16) * 16)
    tm, Mp = _choose_tile(M, cap_m_eff, 16)          # 16-aligned for bf16

    a_p = a.astype(jnp.bfloat16)
    if Mp != M:
        a_p = jnp.pad(a_p, ((0, Mp - M), (0, 0)))
    b_p = b.astype(jnp.bfloat16)

    has_bias = bias is not None
    has_res = residual is not None

    inputs = [a_p, b_p]
    in_specs = [pl.BlockSpec((tm, K), lambda i: (i, 0)),
                pl.BlockSpec((K, N), lambda i: (0, 0))]   # weight resident
    if has_bias:
        inputs.append(bias.astype(jnp.float32).reshape(1, N))
        in_specs.append(pl.BlockSpec((1, N), lambda i: (0, 0)))
    if has_res:
        r_p = residual.astype(jnp.bfloat16)
        if Mp != M:
            r_p = jnp.pad(r_p, ((0, Mp - M), (0, 0)))
        inputs.append(r_p)
        in_specs.append(pl.BlockSpec((tm, N), lambda i: (i, 0)))

    kernel = functools.partial(_mm_resident_kernel, apply_relu=relu,
                               has_bias=has_bias, has_res=has_res)
    out = pl.pallas_call(
        kernel,
        out_shape=jax.ShapeDtypeStruct((Mp, N), out_dtype),
        grid=(Mp // tm,),
        in_specs=in_specs,
        out_specs=pl.BlockSpec((tm, N), lambda i: (i, 0)),
        compiler_params=pltpu.CompilerParams(
            dimension_semantics=("parallel",),
            vmem_limit_bytes=VMEM_LIMIT),
    )(*inputs)
    if Mp != M:
        out = out[:M]
    return out


# ----------------------------------------------------------------------------
# K-tiled fallback matmul (only used if a weight would not fit in VMEM).
# ----------------------------------------------------------------------------
def _mm_kernel(*refs, apply_relu, has_bias, has_res):
    a_ref, b_ref = refs[0], refs[1]
    idx = 2
    bias_ref = res_ref = None
    if has_bias:
        bias_ref = refs[idx]
        idx += 1
    if has_res:
        res_ref = refs[idx]
        idx += 1
    o_ref, acc_ref = refs[idx], refs[idx + 1]

    @pl.when(pl.program_id(2) == 0)
    def _():
        acc_ref[...] = jnp.zeros_like(acc_ref)

    acc_ref[...] += jnp.dot(a_ref[...], b_ref[...],
                            preferred_element_type=jnp.float32)

    @pl.when(pl.program_id(2) == pl.num_programs(2) - 1)
    def _():
        r = acc_ref[...]
        if has_bias:
            r = r + bias_ref[...].astype(jnp.float32)
        if has_res:
            r = r + res_ref[...].astype(jnp.float32)
        if apply_relu:
            r = jnp.maximum(r, 0.0)
        o_ref[...] = r.astype(o_ref.dtype)


def _matmul_ktiled(a, b, bias, residual, relu, out_dtype, cap_m, cap_n, cap_k):
    M, K = a.shape
    _, N = b.shape
    tm, Mp = _choose_tile(M, cap_m, 16)
    tn, Np = _choose_tile(N, cap_n, 128)
    tk, Kp = _choose_tile(K, cap_k, 128)

    a_p = a.astype(jnp.bfloat16)
    if (Mp, Kp) != (M, K):
        a_p = jnp.pad(a_p, ((0, Mp - M), (0, Kp - K)))
    b_p = b.astype(jnp.bfloat16)
    if (Kp, Np) != (K, N):
        b_p = jnp.pad(b_p, ((0, Kp - K), (0, Np - N)))

    has_bias = bias is not None
    has_res = residual is not None

    inputs = [a_p, b_p]
    in_specs = [pl.BlockSpec((tm, tk), lambda i, j, k: (i, k)),
                pl.BlockSpec((tk, tn), lambda i, j, k: (k, j))]
    if has_bias:
        bias_p = bias.astype(jnp.float32).reshape(1, N)
        if Np != N:
            bias_p = jnp.pad(bias_p, ((0, 0), (0, Np - N)))
        inputs.append(bias_p)
        in_specs.append(pl.BlockSpec((1, tn), lambda i, j, k: (0, j)))
    if has_res:
        r_p = residual.astype(jnp.bfloat16)
        if (Mp, Np) != (M, N):
            r_p = jnp.pad(r_p, ((0, Mp - M), (0, Np - N)))
        inputs.append(r_p)
        in_specs.append(pl.BlockSpec((tm, tn), lambda i, j, k: (i, j)))

    kernel = functools.partial(_mm_kernel, apply_relu=relu,
                               has_bias=has_bias, has_res=has_res)
    out = pl.pallas_call(
        kernel,
        out_shape=jax.ShapeDtypeStruct((Mp, Np), out_dtype),
        grid_spec=pltpu.PrefetchScalarGridSpec(
            num_scalar_prefetch=0,
            grid=(Mp // tm, Np // tn, Kp // tk),
            in_specs=in_specs,
            out_specs=pl.BlockSpec((tm, tn), lambda i, j, k: (i, j)),
            scratch_shapes=[pltpu.VMEM((tm, tn), jnp.float32)],
        ),
        compiler_params=pltpu.CompilerParams(
            dimension_semantics=("parallel", "parallel", "arbitrary"),
            vmem_limit_bytes=VMEM_LIMIT),
    )(*inputs)
    if (Mp, Np) != (M, N):
        out = out[:M, :N]
    return out


def pallas_matmul(a, b, bias=None, residual=None, relu=False,
                  out_dtype=jnp.bfloat16, cap_m=512, cap_n=512, cap_k=512):
    """out = act(a @ b + bias + residual); bf16 operands, f32 accumulation."""
    M, K = a.shape
    K2, N = b.shape
    assert K == K2
    if K * N * 2 <= RESIDENT_B_BYTES:
        return _matmul_resident(a, b, bias, residual, relu, out_dtype, cap_m)
    return _matmul_ktiled(a, b, bias, residual, relu, out_dtype,
                          cap_m, cap_n, cap_k)


# ----------------------------------------------------------------------------
# Direct 3x3 / stride-1 convolution.
# The 3 column shifts of the padded frame are lane-concatenated once in VMEM
# (K = 3*cin per matmul), the 3 row shifts become contiguous row slices of the
# flattened concat, and the output is written with no garbage columns.
# ----------------------------------------------------------------------------
def _conv3x3_kernel(a_ref, w_ref, b_ref, o_ref, *, h, w, apply_relu):
    x = a_ref[0]                                             # (h+2, w+2, cin)
    cin = x.shape[-1]
    # lane-concat of the 3 column shifts -> (h+2, w, 3*cin), stays bf16
    xc = jnp.concatenate(
        [x[:, 0:w, :], x[:, 1:w + 1, :], x[:, 2:w + 2, :]], axis=-1)
    xc = xc.reshape((h + 2) * w, 3 * cin)
    acc = jnp.zeros((h * w, w_ref.shape[-1]), jnp.float32)
    for dh in range(3):                                      # 3 deep matmuls
        lhs = xc[dh * w:dh * w + h * w, :]
        acc = acc + jnp.dot(lhs, w_ref[dh],
                            preferred_element_type=jnp.float32)
    r = acc + b_ref[...]
    if apply_relu:
        r = jnp.maximum(r, 0.0)
    o_ref[0] = r.astype(o_ref.dtype)


def _use_direct3(shape):
    _, h, w, _ = shape
    # sublane-clean reshapes need w % 16 == 0 (bf16); tiny maps -> matmul path
    return (w % 16 == 0) and (h * w >= 64)


def conv3x3_direct(x, p, relu=True, out_dtype=jnp.bfloat16):
    """3x3 conv, stride 1, pad 1, folded BN bias + optional ReLU (NHWC)."""
    n, h, w, cin = x.shape
    cout = p["wm"].shape[1]
    w3 = p["wm"].reshape(3, 3 * cin, cout)        # (dh, dw*cin, cout) bf16
    bias = p["bias"].reshape(1, cout)
    xpad = jnp.pad(x, ((0, 0), (1, 1), (1, 1), (0, 0)))

    kernel = functools.partial(_conv3x3_kernel, h=h, w=w, apply_relu=relu)
    out = pl.pallas_call(
        kernel,
        out_shape=jax.ShapeDtypeStruct((n, h * w, cout), out_dtype),
        grid=(n,),
        in_specs=[pl.BlockSpec((1, h + 2, w + 2, cin), lambda i: (i, 0, 0, 0)),
                  pl.BlockSpec((3, 3 * cin, cout), lambda i: (0, 0, 0)),
                  pl.BlockSpec((1, cout), lambda i: (0, 0))],
        out_specs=pl.BlockSpec((1, h * w, cout), lambda i: (i, 0, 0)),
        compiler_params=pltpu.CompilerParams(
            dimension_semantics=("parallel",),
            vmem_limit_bytes=VMEM_LIMIT),
    )(xpad, w3, bias)
    return out.reshape(n, h, w, cout)


# ----------------------------------------------------------------------------
# MaxPool2d(kernel=3, stride=2, pad=1): parity planes via a free metadata
# reshape, 9-way max in bf16 inside the kernel (no extra HBM copies).
# ----------------------------------------------------------------------------
def _maxpool_kernel(x_ref, o_ref, *, c):
    x = x_ref[0]                                   # (hp, 2, wp, 2c)
    p00 = x[:, 0, :, :c]                           # even row, even col
    p01 = x[:, 0, :, c:]                           # even row, odd col
    p10 = x[:, 1, :, :c]                           # odd row, even col
    p11 = x[:, 1, :, c:]                           # odd row, odd col
    ho, wo = o_ref.shape[1], o_ref.shape[2]
    m = p00[:ho, :wo, :]
    m = jnp.maximum(m, p00[:ho, 1:wo + 1, :])
    m = jnp.maximum(m, p00[1:ho + 1, :wo, :])
    m = jnp.maximum(m, p00[1:ho + 1, 1:wo + 1, :])
    m = jnp.maximum(m, p01[:ho, :wo, :])
    m = jnp.maximum(m, p01[1:ho + 1, :wo, :])
    m = jnp.maximum(m, p10[:ho, :wo, :])
    m = jnp.maximum(m, p10[:ho, 1:wo + 1, :])
    m = jnp.maximum(m, p11[:ho, :wo, :])
    o_ref[0] = m.astype(o_ref.dtype)


def max_pool_3x3_s2(x):
    n, h, w, c = x.shape
    eh, ew = h % 2, w % 2
    xp = jnp.pad(x, ((0, 0), (1, 1 + eh), (1, 1 + ew), (0, 0)),
                 constant_values=-jnp.inf)
    h2, w2 = h + 2 + eh, w + 2 + ew
    hp, wp = h2 // 2, w2 // 2
    ho, wo = hp - 1, wp - 1
    # metadata-only reshape: parity planes become static in-kernel slices
    xr = xp.reshape(n, hp, 2, wp, 2 * c)
    kernel = functools.partial(_maxpool_kernel, c=c)
    return pl.pallas_call(
        kernel,
        out_shape=jax.ShapeDtypeStruct((n, ho, wo, c), x.dtype),
        grid=(n,),
        in_specs=[pl.BlockSpec((1, hp, 2, wp, 2 * c),
                               lambda i: (i, 0, 0, 0, 0))],
        out_specs=pl.BlockSpec((1, ho, wo, c), lambda i: (i, 0, 0, 0)),
        compiler_params=pltpu.CompilerParams(
            dimension_semantics=("parallel",),
            vmem_limit_bytes=VMEM_LIMIT),
    )(xr)


# ----------------------------------------------------------------------------
# Pooling / IFFR kernels (single-step; tiny tensors)
# ----------------------------------------------------------------------------
def _gap_kernel(x_ref, o_ref):
    o_ref[...] = jnp.mean(x_ref[...].astype(jnp.float32), axis=1)


def global_avg_pool(x):
    """F.avg_pool2d(x, x.size()[2:]) : NHWC -> (N, C), f32."""
    n, h, w, c = x.shape
    x3 = x.reshape(n, h * w, c)
    return pl.pallas_call(
        _gap_kernel,
        out_shape=jax.ShapeDtypeStruct((n, c), jnp.float32),
    )(x3)


def _tap_kernel(x_ref, o_ref):
    o_ref[...] = jnp.mean(x_ref[...], axis=1)


def temporal_avg_pool(x):
    """x.permute(0,2,1) + F.avg_pool1d(x, t) == mean over t."""
    b, t, d = x.shape
    return pl.pallas_call(
        _tap_kernel,
        out_shape=jax.ShapeDtypeStruct((b, d), jnp.float32),
    )(x)


def _iffr_kernel(x_ref, o_ref):
    """Inter_frame_feature_reorganization, all batch elements in one step."""
    v = x_ref[...]                                           # (b, t, d) f32
    t = v.shape[1]
    l2 = jnp.sqrt(jnp.sum(v * v, axis=-1, keepdims=True) + 1e-12)
    metric = v / l2
    sp = 0.5 * jnp.sum(metric * metric, axis=-1)             # (b, t)
    spM = sp[:, None, :] + sp[:, :, None]                    # (b, t, t)
    mb = metric.astype(jnp.bfloat16)                         # bf16 MXU operands
    mpM = lax.dot_general(mb, mb, (((2,), (2,)), ((0,), (0,))),
                          preferred_element_type=jnp.float32)
    eye = (lax.broadcasted_iota(jnp.int32, (t, t), 0) ==
           lax.broadcasted_iota(jnp.int32, (t, t), 1)).astype(jnp.float32)
    dM = eye[None, :, :] + spM - mpM
    dM = dM - jnp.max(dM, axis=-1, keepdims=True)            # softmax(dim=1)
    e = jnp.exp(dM)
    dM = e / jnp.sum(e, axis=-1, keepdims=True)
    # final mix kept in f32 (numerically sensitive re-id feature path)
    o_ref[...] = lax.dot_general(dM, v, (((2,), (1,)), ((0,), (0,))),
                                 preferred_element_type=jnp.float32)


def inter_frame_feature_reorganization(x):
    b, t, d = x.shape
    return pl.pallas_call(
        _iffr_kernel,
        out_shape=jax.ShapeDtypeStruct((b, t, d), jnp.float32),
    )(x)


# ----------------------------------------------------------------------------
# Convolution wrappers (im2col glue for 7x7 stem, 1x1 and stride-2 3x3 convs)
# ----------------------------------------------------------------------------
def _extract_patches(x, kh, kw, stride, pad):
    n, h, w, c = x.shape
    xp = jnp.pad(x, ((0, 0), (pad, pad), (pad, pad), (0, 0))) if pad > 0 else x
    ho = (h + 2 * pad - kh) // stride + 1
    wo = (w + 2 * pad - kw) // stride + 1
    cols = []
    for dh in range(kh):
        for dw in range(kw):
            cols.append(lax.slice(
                xp, (0, dh, dw, 0),
                (n, dh + (ho - 1) * stride + 1, dw + (wo - 1) * stride + 1, c),
                (1, stride, stride, 1)))
    patches = cols[0] if len(cols) == 1 else jnp.concatenate(cols, axis=-1)
    return patches, ho, wo


def conv_mm(x, p, stride, pad, relu, residual=None, out_dtype=jnp.bfloat16):
    """Conv2d + folded BN + optional ReLU (+ optional fused residual), NHWC."""
    k, wm, bias = p["ksize"], p["wm"], p["bias"]
    n, h, w, cin = x.shape
    if k == 1 and stride == 1 and pad == 0:
        a = x.reshape(n * h * w, cin)
        ho, wo = h, w
    else:
        patches, ho, wo = _extract_patches(x, k, k, stride, pad)
        a = patches.reshape(n * ho * wo, k * k * cin)
    cout = wm.shape[1]
    res2d = residual.reshape(n * ho * wo, cout) if residual is not None else None
    out = pallas_matmul(a, wm, bias=bias, residual=res2d, relu=relu,
                        out_dtype=out_dtype)
    return out.reshape(n, ho, wo, cout)


def bottleneck(x, blk):
    s = blk["stride"]
    out = conv_mm(x, blk["conv1"], stride=1, pad=0, relu=True)
    if s == 1 and _use_direct3(out.shape):
        out = conv3x3_direct(out, blk["conv2"], relu=True)
    else:
        out = conv_mm(out, blk["conv2"], stride=s, pad=1, relu=True)
    if "downsample" in blk:
        identity = conv_mm(x, blk["downsample"], stride=s, pad=0, relu=False)
    else:
        identity = x
    # residual add + ReLU fused into the conv3 matmul epilogue
    return conv_mm(out, blk["conv3"], stride=1, pad=0, relu=True,
                   residual=identity)


# ----------------------------------------------------------------------------
# Deterministic parameter initialization (shapes from torchvision resnet50)
# ----------------------------------------------------------------------------
def _make_conv_bn(key, cin, cout, ksize):
    kw, kg, kb, km, kv = jax.random.split(key, 5)
    fan_in = cin * ksize * ksize
    w = jax.random.normal(kw, (cout, cin, ksize, ksize), jnp.float32) * \
        jnp.sqrt(2.0 / fan_in)
    gamma = jax.random.uniform(kg, (cout,), jnp.float32, 0.8, 1.2)
    beta = 0.01 * jax.random.normal(kb, (cout,), jnp.float32)
    running_mean = 0.01 * jax.random.normal(km, (cout,), jnp.float32)
    running_var = jax.random.uniform(kv, (cout,), jnp.float32, 0.9, 1.1)
    eps = 1e-5
    scale = gamma / jnp.sqrt(running_var + eps)
    bias = beta - running_mean * scale
    return {"w": w, "scale": scale, "bias": bias, "ksize": ksize}


def init_resnet50tp_params(key, num_classes):
    keys = list(jax.random.split(key, 64))
    ki = iter(keys)
    params = {"conv1": _make_conv_bn(next(ki), 3, 64, 7)}
    cfg = [("layer1", 64, 3, 1), ("layer2", 128, 4, 2),
           ("layer3", 256, 6, 2), ("layer4", 512, 3, 2)]
    inplanes = 64
    for name, planes, nblocks, stride in cfg:
        blocks = []
        for i in range(nblocks):
            s = stride if i == 0 else 1
            blk = {
                "stride": s,
                "conv1": _make_conv_bn(next(ki), inplanes, planes, 1),
                "conv2": _make_conv_bn(next(ki), planes, planes, 3),
                "conv3": _make_conv_bn(next(ki), planes, planes * 4, 1),
            }
            if s != 1 or inplanes != planes * 4:
                blk["downsample"] = _make_conv_bn(next(ki), inplanes,
                                                  planes * 4, 1)
            blocks.append(blk)
            inplanes = planes * 4
        params[name] = blocks
    wc, bc = jax.random.split(next(ki))
    bound = 1.0 / float(jnp.sqrt(2048.0))
    params["classifier"] = {
        "w": jax.random.uniform(wc, (num_classes, 2048), jnp.float32,
                                -bound, bound),
        "b": jax.random.uniform(bc, (num_classes,), jnp.float32,
                                -bound, bound),
    }
    return params


# ----------------------------------------------------------------------------
# One-time parameter preparation: fold BN, transpose, cast weights to bf16.
# ----------------------------------------------------------------------------
def _fold_bn(p):
    return p["w"].astype(jnp.float32) * p["scale"][:, None, None, None]


def _prep_mm(p):
    w = _fold_bn(p)
    cout, cin, kh, kw = w.shape
    # (dh, dw, cin, cout) flattened -> also reinterpretable as (3, 3*cin, cout)
    wm = jnp.transpose(w, (2, 3, 1, 0)).reshape(kh * kw * cin, cout)
    return {"ksize": kh, "wm": wm.astype(jnp.bfloat16),
            "bias": p["bias"].astype(jnp.float32)}


def prepare_params(params):
    prep = {"conv1": _prep_mm(params["conv1"])}
    for name in ("layer1", "layer2", "layer3", "layer4"):
        blocks = []
        for blk in params[name]:
            nb = {"stride": blk["stride"],
                  "conv1": _prep_mm(blk["conv1"]),
                  "conv2": _prep_mm(blk["conv2"]),
                  "conv3": _prep_mm(blk["conv3"])}
            if "downsample" in blk:
                nb["downsample"] = _prep_mm(blk["downsample"])
            blocks.append(nb)
        prep[name] = blocks
    prep["classifier"] = {
        "w_t": params["classifier"]["w"].T.astype(jnp.bfloat16),
        "b": params["classifier"]["b"].astype(jnp.float32),
    }
    return prep


# ----------------------------------------------------------------------------
# Forward pass (== ResNet50TP.forward)
# ----------------------------------------------------------------------------
def resnet50tp_forward(params, x, *, iffr=True, training=True,
                       loss=frozenset({"xent"})):
    b, t = x.shape[0], x.shape[1]
    x = x.reshape(b * t, x.shape[2], x.shape[3], x.shape[4])      # (b*t,C,H,W)
    x = jnp.transpose(x, (0, 2, 3, 1)).astype(jnp.bfloat16)       # -> NHWC

    # self.base = resnet50 children [:-2]
    x = conv_mm(x, params["conv1"], stride=2, pad=3, relu=True)
    x = max_pool_3x3_s2(x)
    for name in ("layer1", "layer2", "layer3", "layer4"):
        for blk in params[name]:
            x = bottleneck(x, blk)

    feat = global_avg_pool(x)              # F.avg_pool2d(x, x.size()[2:])
    feat = feat.reshape(b, t, -1)          # (b, t, 2048)
    if iffr:
        feat = inter_frame_feature_reorganization(feat)
    f = temporal_avg_pool(feat)            # permute + avg_pool1d(t) -> (b,2048)

    if not training:
        return f
    y = pallas_matmul(f, params["classifier"]["w_t"],
                      bias=params["classifier"]["b"], relu=False,
                      out_dtype=jnp.float32)
    loss = set(loss)
    if loss == {"xent"}:
        return y
    elif loss == {"xent", "htri"} or loss == {"cent"}:
        return y, f
    else:
        raise KeyError("Unsupported loss: {}".format(loss))


# ----------------------------------------------------------------------------
if __name__ == "__main__":
    key = jax.random.PRNGKey(0)
    pkey, xkey = jax.random.split(key)

    num_classes = 10
    b, t, C, H, W = 2, 8, 3, 64, 64       # (batch, seq, channels, height, width)

    raw_params = init_resnet50tp_params(pkey, num_classes)
    params = prepare_params(raw_params)   # fold BN / transpose / bf16, once
    x = jax.random.normal(xkey, (b, t, C, H, W), dtype=jnp.float32)

    # training-mode forward with loss={'xent'} -> logits (b, num_classes)
    y = resnet50tp_forward(params, x, iffr=True, training=True)
    y = jax.block_until_ready(y)
    assert y.shape == (b, num_classes), y.shape
    assert bool(jnp.all(jnp.isfinite(y)))

    # eval-mode forward -> pooled feature f of shape (b, 2048)
    f = resnet50tp_forward(params, x, iffr=True, training=False)
    f = jax.block_until_ready(f)
    assert f.shape == (b, 2048), f.shape
    assert bool(jnp.all(jnp.isfinite(f)))

    print("KERNEL_OK")
</pallas_src>

<mosaic_0001>
module attributes {stable_mosaic.version = 11 : i64} {
  func.func @_mm_resident_kernel(%arg0: i32, %arg1: memref<512x147xbf16, #tpu.memory_space<vmem>>, %arg2: memref<147x64xbf16, #tpu.memory_space<vmem>>, %arg3: memref<1x64xf32, #tpu.memory_space<vmem>>, %arg4: memref<512x64xbf16, #tpu.memory_space<vmem>>) attributes {dimension_semantics = [#tpu.dimension_semantics<parallel>], iteration_bounds = array<i64: 32>, scalar_prefetch = 0 : i64, scratch_operands = 0 : i64, tpu.core_type = #tpu.core_type<tc>, window_params = [{transform_indices = @transform_0, window_bounds = array<i64: 512, 147>}, {pipeline_mode = #tpu.pipeline_mode<synchronous>, transform_indices = @transform_1, window_bounds = array<i64: 147, 64>}, {pipeline_mode = #tpu.pipeline_mode<synchronous>, transform_indices = @transform_2, window_bounds = array<i64: 1, 64>}, {transform_indices = @transform_3, window_bounds = array<i64: 512, 64>}]} {
    %c0 = arith.constant 0 : index
    %c0_0 = arith.constant 0 : index
    %0 = vector.load %arg1[%c0, %c0_0] : memref<512x147xbf16, #tpu.memory_space<vmem>>, vector<512x147xbf16>
    %c0_1 = arith.constant 0 : index
    %c0_2 = arith.constant 0 : index
    %1 = vector.load %arg2[%c0_1, %c0_2] : memref<147x64xbf16, #tpu.memory_space<vmem>>, vector<147x64xbf16>
    %cst = arith.constant dense<0.000000e+00> : vector<512x64xf32>
    %2 = tpu.matmul %0, %1, %cst {dimension_numbers = #tpu.dot_dimension_numbers<[1], [0], [0], [1], [0, 0, 1, 1], [], []>} : vector<512x147xbf16>, vector<147x64xbf16>, vector<512x64xf32> -> vector<512x64xf32>
    %c0_3 = arith.constant 0 : index
    %c0_4 = arith.constant 0 : index
    %3 = vector.load %arg3[%c0_3, %c0_4] : memref<1x64xf32, #tpu.memory_space<vmem>>, vector<1x64xf32>
    %4 = vector.broadcast %3 : vector<1x64xf32> to vector<512x64xf32>
    %5 = arith.addf %2, %4 : vector<512x64xf32>
    %cst_5 = arith.constant 0.000000e+00 : f32
    %6 = vector.broadcast %cst_5 : f32 to vector<512x64xf32>
    %7 = arith.maximumf %5, %6 : vector<512x64xf32>
    %8 = arith.truncf %7 : vector<512x64xf32> to vector<512x64xbf16>
    %c0_6 = arith.constant 0 : index
    %c0_7 = arith.constant 0 : index
    %9 = vector.load %arg4[%c0_6, %c0_7] : memref<512x64xbf16, #tpu.memory_space<vmem>>, vector<512x64xbf16>
    tpu.vector_store %arg4[%c0_6, %c0_7], %8 {strides = array<i32>} : memref<512x64xbf16, #tpu.memory_space<vmem>>, vector<512x64xbf16>,
    return
  }
  func.func @transform_0(%arg0: i32) -> (i32, i32) {
    %c0_i32 = arith.constant 0 : i32
    %c0_i32_0 = arith.constant 0 : i32
    return %arg0, %c0_i32 : i32, i32
  }
  func.func @transform_1(%arg0: i32) -> (i32, i32) {
    %c0_i32 = arith.constant 0 : i32
    %c0_i32_0 = arith.constant 0 : i32
    %c0_i32_1 = arith.constant 0 : i32
    return %c0_i32, %c0_i32_0 : i32, i32
  }
  func.func @transform_2(%arg0: i32) -> (i32, i32) {
    %c0_i32 = arith.constant 0 : i32
    %c0_i32_0 = arith.constant 0 : i32
    %c0_i32_1 = arith.constant 0 : i32
    return %c0_i32, %c0_i32_0 : i32, i32
  }
  func.func @transform_3(%arg0: i32) -> (i32, i32) {
    %c0_i32 = arith.constant 0 : i32
    %c0_i32_0 = arith.constant 0 : i32
    return %arg0, %c0_i32 : i32, i32
  }
}

</mosaic_0001>

<bundles_post_ra>
// kernel: tpu_custom_call.1
= control target key start
LH: loop header
LB: loop body
LE: loop exit
PB: predicated region body
PF: predicated region fallthrough
CT: control target
= control target key end

     0   :  { %s1761_s12 = smov 0   ;;  %s2221_s0 = inlined_call_operand.vmem [shape: bf16[16384,147], index: 0, kind: input, shape index: {}]   ;;  %s2222_s1 = inlined_call_operand.vmem [shape: bf16[147,64], index: 1, kind: input, shape index: {}]   ;;  %s2223_s2 = inlined_call_operand.vmem [shape: f32[1,64], index: 2, kind: input, shape index: {}]   ;;  %s2224_s3 = inlined_call_operand.vmem [shape: bf16[16384,64], index: 3, kind: output, shape index: {}]  }
   0x1 LB: > { %s1301_s13 = sadd.s32 4294967295, %s1738_s12   ;;  %p1305_p0 = scmp.ge.s32.totalorder %s1738_s12, 1  ;;  %s1738_s12 = sphi %s1761_s12, %s13_s12  }
   0x2   : > { %p139_p1 = scmp.lt.s32.totalorder %s1738_s12, 33 }
   0x4   : > { %p140_p2 = pnand %p1305_p0, %p139_p1 }
   0x5   : > { %s1306_s18 = sshll.u32 (!%p140_p2), %s1301_s13, 6 }
   0x6   : > { %143 = sbr.rel (%p140_p2) target bundleno = 432 (0x1b0), region = 32  ;;  %p165_p3 = scmp.lt.s32.totalorder (!%p140_p2), %s1306_s18, 2047 }
   0xb   : > { %v1709_v0 = vld [vmem:[%s2222_s1 + $0x38] sm:$0xff]  ;;  %v260_v1 = vld [vmem:[%s2222_s1 + $0x48] sm:$0x3]  ;;  %vm707_vm0 = vcmask 1040384   ;;  %vm708_vm1 = vcmask 1041408   ;;  %v1708_v3 = vld [vmem:[%s2222_s1 + $0x30] sm:$0xff] }
   0xc   : > { %v590_v2 = vunpack.c.l.b16 %v260_v1  ;;  %714 = vmatpush.bf16.msra.mxu0 %v1709_v0  ;;  %1711 = vmatpush.bf16.msra.mxu2 %v1709_v0  ;;  %v1740_v4 = vmov 65535   ;;  %s2226_s18 = smov (!%p165_p3, %s1306_s18), 2047  ;;  %v1707_v9 = vld [vmem:[%s2222_s1 + $0x28] sm:$0xff]  ;;  %v1710_v10 = vld [vmem:[%s2222_s1 + $0x40] sm:$0xff]  ;;  %vm610_vm2 = vcmask 154624   ;;  %v1705_v18 = vld [vmem:[%s2222_s1 + $0x18] sm:$0xff] }
   0xd   : > { %v709_v5 = vsel %vm707_vm0, 4294967295, %v1740_v4  ;;  %s1637_s23 = sshll.u32 %s2226_s18, 3  ;;  %v1706_v14 = vld [vmem:[%s2222_s1 + $0x20] sm:$0xff]  ;;  %v1704_v19 = vld [vmem:[%s2222_s1 + $0x10] sm:$0xff]  ;;  %v1703_v20 = vld [vmem:[%s2222_s1 + $0x8] sm:$0xff]  ;;  %s1310_s15 = sshll.u32 %s2226_s18, 2 }
   0xe   : > { %v600_v6 = vpack.c.b16 %v590_v2, %v590_v2  ;;  %v710_v7 = vsel %vm708_vm1, %v709_v5, 0  ;;  %s1790_s28 = scalar_lea.vmem %s2221_s0, %s1637_s23  ;;  %v1702_v26 = vld [vmem:[%s2222_s1] sm:$0xff]  ;;  %s1919_s19 = scalar_lea.vmem %s2224_s3, %s1310_s15  ;;  %vm1180_vm3 = vcmask 519168  }
   0xf   : > { %v1638_v11 = vld [vmem:[%s1790_s28 + $0x4] sm:$0xf]  ;;  %v1315_v12 = vld [vmem:[%s1790_s28 + $0x8] sm:$0xf0]  ;;  %v1672_v15 = vld [vmem:[%s1790_s28 + $0x114] sm:$0xf] }
  0x10   : > { %v712_v8 = vand.u32 %v710_v7, %v600_v6  ;;  %715 = vmatpush.bf16.msra.mxu0 %v1708_v3  ;;  %1712 = vmatpush.bf16.msra.mxu2 %v1708_v3  ;;  %v1318_v13 = vor.u32 %v1638_v11, %v1315_v12  ;;  %v1451_v16 = vld [vmem:[%s1790_s28 + $0x118] sm:$0xf0]  ;;  %v1640_v21 = vld [vmem:[%s1790_s28 + $0x14] sm:$0xf]  ;;  %v1674_v23 = vld [vmem:[%s1790_s28 + $0x124] sm:$0xf] }
  0x11   : > { %v1454_v17 = vor.u32 %v1672_v15, %v1451_v16  ;;  %v1323_v22 = vld [vmem:[%s1790_s28 + $0x18] sm:$0xf0]  ;;  %v1459_v24 = vld [vmem:[%s1790_s28 + $0x128] sm:$0xf0]  ;;  %v1313_v27 = vld [vmem:[%s1790_s28] sm:$0xf] }
  0x12   : > { %889 = vmatpush.bf16.msra.mxu1 %v712_v8  ;;  %1719 = vmatpush.bf16.msra.mxu3 %v712_v8  ;;  %v1326_v25 = vor.u32 %v1640_v21, %v1323_v22  ;;  %v1639_v28 = vld [vmem:[%s1790_s28 + $0x4] sm:$0xf0]  ;;  %v1441_v29 = vld [vmem:[%s1790_s28 + $0x100] sm:$0xf]  ;;  %v1462_v31 = vor.u32 %v1674_v23, %v1459_v24  ;;  %v1642_v34 = vld [vmem:[%s1790_s28 + $0x24] sm:$0xf] }
  0x13   : > { %v1671_v30 = vld [vmem:[%s1790_s28 + $0x104] sm:$0xf0]  ;;  %v1314_v32 = vor.u32 %v1639_v28, %v1313_v27  ;;  %v1331_v35 = vld [vmem:[%s1790_s28 + $0x28] sm:$0xf0]  ;;  %v1676_v36 = vld [vmem:[%s1790_s28 + $0x134] sm:$0xf] }
  0x14   : > { %716 = vmatpush.bf16.msra.mxu0 %v1707_v9  ;;  %1713 = vmatpush.bf16.msra.mxu2 %v1707_v9  ;;  %v1442_v33 = vor.u32 %v1671_v30, %v1441_v29  ;;  %v1467_v37 = vld [vmem:[%s1790_s28 + $0x138] sm:$0xf0]  ;;  %v1334_v38 = vor.u32 %v1642_v34, %v1331_v35  ;;  %v1321_v39 = vld [vmem:[%s1790_s28 + $0x10] sm:$0xf]  ;;  %v1641_v40 = vld [vmem:[%s1790_s28 + $0x14] sm:$0xf0] }
  0x15   : > { %v1449_v41 = vld [vmem:[%s1790_s28 + $0x110] sm:$0xf]  ;;  %v1673_v42 = vld [vmem:[%s1790_s28 + $0x114] sm:$0xf0]  ;;  %v1470_v43 = vor.u32 %v1676_v36, %v1467_v37  ;;  %v1322_v44 = vor.u32 %v1641_v40, %v1321_v39  ;;  %v1644_v46 = vld [vmem:[%s1790_s28 + $0x34] sm:$0xf] }
  0x16   : > { %890 = vmatpush.bf16.msra.mxu1 %v1710_v10  ;;  %1720 = vmatpush.bf16.msra.mxu3 %v1710_v10  ;;  %v1450_v45 = vor.u32 %v1673_v42, %v1449_v41  ;;  %v1339_v47 = vld [vmem:[%s1790_s28 + $0x38] sm:$0xf0]  ;;  %v1678_v48 = vld [vmem:[%s1790_s28 + $0x144] sm:$0xf]  ;;  %v1475_v49 = vld [vmem:[%s1790_s28 + $0x148] sm:$0xf0] }
  0x17   : > { %v1342_v50 = vor.u32 %v1644_v46, %v1339_v47  ;;  %v1329_v51 = vld [vmem:[%s1790_s28 + $0x20] sm:$0xf]  ;;  %v1643_v52 = vld [vmem:[%s1790_s28 + $0x24] sm:$0xf0]  ;;  %v1478_v55 = vor.u32 %v1678_v48, %v1475_v49  ;;  %v1646_v58 = vld [vmem:[%s1790_s28 + $0x44] sm:$0xf] }
  0x18   : > { %717 = vmatpush.bf16.msra.mxu0 %v1706_v14  ;;  %1714 = vmatpush.bf16.msra.mxu2 %v1706_v14  ;;  %v1457_v53 = vld [vmem:[%s1790_s28 + $0x120] sm:$0xf]  ;;  %v1675_v54 = vld [vmem:[%s1790_s28 + $0x124] sm:$0xf0]  ;;  %v1330_v56 = vor.u32 %v1643_v52, %v1329_v51  ;;  %v1347_v59 = vld [vmem:[%s1790_s28 + $0x48] sm:$0xf0] }
  0x19   : > { %1603 = vmatmul.msk.bf16.vlgmr.msra.gmra.mxu1 %vm610_vm2, %v1318_v13  ;;  %1620 = vmatmul.msk.bf16.vlgmr.msra.gmra.mxu3 %vm610_vm2, %v1454_v17  ;;  %v1458_v57 = vor.u32 %v1675_v54, %v1457_v53  ;;  %v1680_v60 = vld [vmem:[%s1790_s28 + $0x154] sm:$0xf]  ;;  %v1483_v61 = vld [vmem:[%s1790_s28 + $0x158] sm:$0xf0]  ;;  %v1350_v62 = vor.u32 %v1646_v58, %v1347_v59  ;;  %v1337_v63 = vld [vmem:[%s1790_s28 + $0x30] sm:$0xf] }
  0x1a   : > { %v1645_v0 = vld [vmem:[%s1790_s28 + $0x34] sm:$0xf0]  ;;  %v1465_v1 = vld [vmem:[%s1790_s28 + $0x130] sm:$0xf]  ;;  %v1486_v3 = vor.u32 %v1680_v60, %v1483_v61  ;;  %v1648_v6 = vld [vmem:[%s1790_s28 + $0x54] sm:$0xf] }
  0x1b   : > { %v1677_v2 = vld [vmem:[%s1790_s28 + $0x134] sm:$0xf0]  ;;  %v1338_v4 = vor.u32 %v1645_v0, %v1337_v63  ;;  %v1355_v7 = vld [vmem:[%s1790_s28 + $0x58] sm:$0xf0]  ;;  %v1682_v8 = vld [vmem:[%s1790_s28 + $0x164] sm:$0xf] }
  0x1c   : > { %718 = vmatpush.bf16.msra.mxu0 %v1705_v18  ;;  %1715 = vmatpush.bf16.msra.mxu2 %v1705_v18  ;;  %v1466_v5 = vor.u32 %v1677_v2, %v1465_v1  ;;  %v1491_v9 = vld [vmem:[%s1790_s28 + $0x168] sm:$0xf0]  ;;  %v1358_v10 = vor.u32 %v1648_v6, %v1355_v7  ;;  %v1345_v11 = vld [vmem:[%s1790_s28 + $0x40] sm:$0xf]  ;;  %v1647_v12 = vld [vmem:[%s1790_s28 + $0x44] sm:$0xf0] }
  0x1d   : > { %v1473_v13 = vld [vmem:[%s1790_s28 + $0x140] sm:$0xf]  ;;  %v1679_v14 = vld [vmem:[%s1790_s28 + $0x144] sm:$0xf0]  ;;  %v1494_v15 = vor.u32 %v1682_v8, %v1491_v9  ;;  %v1346_v16 = vor.u32 %v1647_v12, %v1345_v11  ;;  %v1650_v18 = vld [vmem:[%s1790_s28 + $0x64] sm:$0xf] }
  0x1e   : > { %v1474_v17 = vor.u32 %v1679_v14, %v1473_v13  ;;  %v1499_v21 = vld [vmem:[%s1790_s28 + $0x178] sm:$0xf0]  ;;  %v1353_v23 = vld [vmem:[%s1790_s28 + $0x50] sm:$0xf]  ;;  %v1649_v24 = vld [vmem:[%s1790_s28 + $0x54] sm:$0xf0] }
  0x1f   : > { %v1354_v28 = vor.u32 %v1649_v24, %v1353_v23  ;;  %v1652_v30 = vld [vmem:[%s1790_s28 + $0x74] sm:$0xf]  ;;  %v1361_v35 = vld [vmem:[%s1790_s28 + $0x60] sm:$0xf]  ;;  %v1651_v36 = vld [vmem:[%s1790_s28 + $0x64] sm:$0xf0] }
  0x20   : > { %719 = vmatpush.bf16.msra.mxu0 %v1704_v19  ;;  %1716 = vmatpush.bf16.msra.mxu2 %v1704_v19  ;;  %v1363_v19 = vld [vmem:[%s1790_s28 + $0x68] sm:$0xf0]  ;;  %v1489_v37 = vld [vmem:[%s1790_s28 + $0x160] sm:$0xf]  ;;  %v1362_v40 = vor.u32 %v1651_v36, %v1361_v35  ;;  %v1654_v42 = vld [vmem:[%s1790_s28 + $0x84] sm:$0xf] }
  0x21   : > { %v1366_v22 = vor.u32 %v1650_v18, %v1363_v19  ;;  %v1369_v47 = vld [vmem:[%s1790_s28 + $0x70] sm:$0xf]  ;;  %v1653_v48 = vld [vmem:[%s1790_s28 + $0x74] sm:$0xf0]  ;;  %v1387_v58 = vld [vmem:[%s1790_s28 + $0x98] sm:$0xf0] }
  0x22   : > { %v1685_v51 = vld [vmem:[%s1790_s28 + $0x174] sm:$0xf0]  ;;  %v1370_v53 = vor.u32 %v1653_v48, %v1369_v47  ;;  %v1690_v59 = vld [vmem:[%s1790_s28 + $0x1a4] sm:$0xf]  ;;  %v1523_v60 = vld [vmem:[%s1790_s28 + $0x1a8] sm:$0xf0] }
  0x23   : > { %v1655_v63 = vld [vmem:[%s1790_s28 + $0x84] sm:$0xf0]  ;;  %v1906_v2 = vld [vmem:[%s2223_s2] ss:$0 sm:$0xff]  ;;  %v1658_v18 = vld [vmem:[%s1790_s28 + $0xa4] sm:$0xf] }
  0x24   : > { %720 = vmatpush.bf16.msra.mxu0 %v1703_v20  ;;  %1717 = vmatpush.bf16.msra.mxu2 %v1703_v20  ;;  %v1684_v20 = vld [vmem:[%s1790_s28 + $0x174] sm:$0xf]  ;;  %v1395_v19 = vld [vmem:[%s1790_s28 + $0xa8] sm:$0xf0]  ;;  %v1385_v24 = vld [vmem:[%s1790_s28 + $0x90] sm:$0xf] }
  0x25   : > { %v1502_v27 = vor.u32 %v1684_v20, %v1499_v21  ;;  %v1692_v21 = vld [vmem:[%s1790_s28 + $0x1b4] sm:$0xf]  ;;  %v1398_v23 = vor.u32 %v1658_v18, %v1395_v19  ;;  %v1403_v48 = vld [vmem:[%s1790_s28 + $0xb8] sm:$0xf0] }
  0x26   : > { %v1660_v47 = vld [vmem:[%s1790_s28 + $0xb4] sm:$0xf] }
  0x28   : > { %721 = vmatpush.bf16.msra.mxu0 %v1702_v26  ;;  %1718 = vmatpush.bf16.msra.mxu2 %v1702_v26  ;;  %v1681_v26 = vld [vmem:[%s1790_s28 + $0x154] sm:$0xf0] }
  0x29   : > { %1604 = vmatmul.msk.bf16.gmra.mxu1 %vm610_vm2, %v1326_v25  ;;  %1621 = vmatmul.msk.bf16.gmra.mxu3 %vm610_vm2, %v1462_v31  ;;  %v1481_v25 = vld [vmem:[%s1790_s28 + $0x150] sm:$0xf]  ;;  %v1371_v31 = vld [vmem:[%s1790_s28 + $0x78] sm:$0xf0] }
  0x2a   : > { %v1482_v29 = vor.u32 %v1681_v26, %v1481_v25  ;;  %v1374_v34 = vor.u32 %v1652_v30, %v1371_v31  ;;  %v1657_v25 = vld [vmem:[%s1790_s28 + $0x94] sm:$0xf0] }
  0x2b   : > { %722 = vmatmul.bf16.vlgmr.msra.gmra.mxu0 %v1314_v32  ;;  %802 = vmatmul.bf16.vlgmr.msra.gmra.mxu2 %v1442_v33  ;;  %v1686_v32 = vld [vmem:[%s1790_s28 + $0x184] sm:$0xf]  ;;  %v1507_v33 = vld [vmem:[%s1790_s28 + $0x188] sm:$0xf0]  ;;  %v1689_v30 = vld [vmem:[%s1790_s28 + $0x194] sm:$0xf0] }
  0x2c   : > { %v1510_v39 = vor.u32 %v1686_v32, %v1507_v33 }
  0x39   : > { %1605 = vmatmul.msk.bf16.gmra.mxu1 %vm610_vm2, %v1334_v38  ;;  %1622 = vmatmul.msk.bf16.gmra.mxu3 %vm610_vm2, %v1470_v43  ;;  %v1683_v38 = vld [vmem:[%s1790_s28 + $0x164] sm:$0xf0]  ;;  %v1379_v43 = vld [vmem:[%s1790_s28 + $0x88] sm:$0xf0] }
  0x3a   : > { %v1490_v41 = vor.u32 %v1683_v38, %v1489_v37  ;;  %v1382_v46 = vor.u32 %v1654_v42, %v1379_v43 }
  0x3b   : > { %727 = vmatmul.bf16.gmra.mxu0 %v1322_v44  ;;  %807 = vmatmul.bf16.gmra.mxu2 %v1450_v45  ;;  %v1688_v44 = vld [vmem:[%s1790_s28 + $0x194] sm:$0xf]  ;;  %v1515_v45 = vld [vmem:[%s1790_s28 + $0x198] sm:$0xf0] }
  0x3c   : > { %v1518_v52 = vor.u32 %v1688_v44, %v1515_v45 }
  0x49   : > { %1606 = vmatmul.msk.bf16.gmra.mxu1 %vm610_vm2, %v1342_v50  ;;  %1623 = vmatmul.msk.bf16.gmra.mxu3 %vm610_vm2, %v1478_v55  ;;  %v1497_v50 = vld [vmem:[%s1790_s28 + $0x170] sm:$0xf] }
  0x4a   : > { %v1498_v54 = vor.u32 %v1685_v51, %v1497_v50  ;;  %v1694_v51 = vld [vmem:[%s1790_s28 + $0x1c4] sm:$0xf] }
  0x4b   : > { %732 = vmatmul.bf16.gmra.mxu0 %v1330_v56  ;;  %812 = vmatmul.bf16.gmra.mxu2 %v1458_v57  ;;  %v1656_v57 = vld [vmem:[%s1790_s28 + $0x94] sm:$0xf] }
  0x4c   : > { %v1390_v61 = vor.u32 %v1656_v57, %v1387_v58  ;;  %v1659_v57 = vld [vmem:[%s1790_s28 + $0xa4] sm:$0xf0] }
  0x59   : > { %1607 = vmatmul.msk.bf16.gmra.mxu1 %vm610_vm2, %v1350_v62  ;;  %1624 = vmatmul.msk.bf16.gmra.mxu3 %vm610_vm2, %v1486_v3  ;;  %v1377_v62 = vld [vmem:[%s1790_s28 + $0x80] sm:$0xf] }
  0x5a   : > { %v1505_v3 = vld [vmem:[%s1790_s28 + $0x180] sm:$0xf]  ;;  %v1378_v6 = vor.u32 %v1655_v63, %v1377_v62  ;;  %v1691_v62 = vld [vmem:[%s1790_s28 + $0x1a4] sm:$0xf0] }
  0x5b   : > { %737 = vmatmul.bf16.gmra.mxu0 %v1338_v4  ;;  %817 = vmatmul.bf16.gmra.mxu2 %v1466_v5  ;;  %v1687_v4 = vld [vmem:[%s1790_s28 + $0x184] sm:$0xf0]  ;;  %v1526_v5 = vor.u32 %v1690_v59, %v1523_v60 }
  0x5c   : > { %v1506_v8 = vor.u32 %v1687_v4, %v1505_v3 }
  0x69   : > { %1608 = vmatmul.msk.bf16.gmra.mxu1 %vm610_vm2, %v1358_v10  ;;  %1625 = vmatmul.msk.bf16.gmra.mxu3 %vm610_vm2, %v1494_v15 }
  0x6b   : > { %742 = vmatmul.bf16.gmra.mxu0 %v1346_v16  ;;  %822 = vmatmul.bf16.gmra.mxu2 %v1474_v17 }
  0x79   : > { %1609 = vmatmul.msk.bf16.gmra.mxu1 %vm610_vm2, %v1366_v22  ;;  %1626 = vmatmul.msk.bf16.gmra.mxu3 %vm610_vm2, %v1502_v27  ;;  %v1531_v22 = vld [vmem:[%s1790_s28 + $0x1b8] sm:$0xf0] }
  0x7a   : > { %v1534_v31 = vor.u32 %v1692_v21, %v1531_v22  ;;  %v1662_v22 = vld [vmem:[%s1790_s28 + $0xc4] sm:$0xf] }
  0x7b   : > { %747 = vmatmul.bf16.gmra.mxu0 %v1354_v28  ;;  %827 = vmatmul.bf16.gmra.mxu2 %v1482_v29  ;;  %v1513_v29 = vld [vmem:[%s1790_s28 + $0x190] sm:$0xf] }
  0x7c   : > { %v1514_v36 = vor.u32 %v1689_v30, %v1513_v29 }
  0x89   : > { %1610 = vmatmul.msk.bf16.gmra.mxu1 %vm610_vm2, %v1374_v34  ;;  %1627 = vmatmul.msk.bf16.gmra.mxu3 %vm610_vm2, %v1510_v39  ;;  %v1386_v34 = vor.u32 %v1657_v25, %v1385_v24 }
  0x8b   : > { %752 = vmatmul.bf16.gmra.mxu0 %v1362_v40  ;;  %832 = vmatmul.bf16.gmra.mxu2 %v1490_v41 }
  0x96   : > { %v892_v49 = vpop.f32.mrf.mxu1 }
  0x99   : > { %1611 = vmatmul.msk.bf16.gmra.mxu1 %vm610_vm2, %v1382_v46  ;;  %1628 = vmatmul.msk.bf16.gmra.mxu3 %vm610_vm2, %v1518_v52  ;;  %v1539_v52 = vld [vmem:[%s1790_s28 + $0x1c8] sm:$0xf0] }
  0x9a   : > { %v1542_v63 = vor.u32 %v1694_v51, %v1539_v52 }
  0x9b   : > { %757 = vmatmul.bf16.gmra.mxu0 %v1370_v53  ;;  %837 = vmatmul.bf16.gmra.mxu2 %v1498_v54  ;;  %v1406_v54 = vor.u32 %v1660_v47, %v1403_v48 }
  0x9c   : > { %v1893_v55 = vpop.f32.mrf.mxu3 }
  0x9e   : > { %v894_v56 = vpop.f32.mrf.mxu1 }
  0xa4   : > { %v1901_v0 = vpop.f32.mrf.mxu3 }
  0xa6   : > { %v897_v1 = vpop.f32.mrf.mxu1 }
  0xa8   : > { %v723_v7 = vpop.f32.mrf.mxu0 }
  0xa9   : > { %1612 = vmatmul.msk.bf16.gmra.mxu1 %vm610_vm2, %v1390_v61  ;;  %v724_v9 = vadd.f32 %v1906_v2, %v723_v7  ;;  %1629 = vmatmul.msk.bf16.gmra.mxu3 %vm610_vm2, %v1526_v5  ;;  %v1521_v61 = vld [vmem:[%s1790_s28 + $0x1a0] sm:$0xf] }
  0xaa   : > { %v1522_v7 = vor.u32 %v1691_v62, %v1521_v61  ;;  %v1664_v61 = vld [vmem:[%s1790_s28 + $0xd4] sm:$0xf]  ;;  %v1419_v62 = vld [vmem:[%s1790_s28 + $0xd8] sm:$0xf0] }
  0xab   : > { %v893_v10 = vadd.f32 %v892_v49, %v724_v9  ;;  %762 = vmatmul.bf16.gmra.mxu0 %v1378_v6  ;;  %842 = vmatmul.bf16.gmra.mxu2 %v1506_v8 }
  0xac   : > { %v1914_v11 = vpop.f32.mrf.mxu3 }
  0xad   : > { %v1052_v12 = vmax.f32 %v893_v10, 0.0 }
  0xae   : > { %v899_v13 = vpop.f32.mrf.mxu1  ;;  %v1921_v15 = vpop.f32.mrf.mxu2 }
  0xaf   : > { %v1116_v14 = vpack.c.bf16 %v1052_v12, %v1052_v12 }
  0xb0   : > { %v725_v16 = vpop.f32.mrf.mxu0 }
  0xb1   : > { %1181 = vst.msk [vmem:[%s1919_s19] sm:$0xf] %vm1180_vm3, %v1116_v14  ;;  %v726_v17 = vadd.f32 %v1906_v2, %v725_v16 }
  0xb3   : > { %v895_v20 = vadd.f32 %v894_v56, %v726_v17  ;;  %v1393_v56 = vld [vmem:[%s1790_s28 + $0xa0] sm:$0xf] }
  0xb4   : > { %v1932_v26 = vpop.f32.mrf.mxu3 }
  0xb5   : > { %v1053_v27 = vmax.f32 %v895_v20, 0.0 }
  0xb6   : > { %v902_v28 = vpop.f32.mrf.mxu1  ;;  %v1936_v33 = vpop.f32.mrf.mxu2 }
  0xb7   : > { %v1117_v32 = vpack.c.bf16 %v1053_v27, %v1053_v27  ;;  %v1696_v27 = vld [vmem:[%s1790_s28 + $0x1d4] sm:$0xf] }
  0xb8   : > { %v728_v35 = vpop.f32.mrf.mxu0 }
  0xb9   : > { %1613 = vmatmul.msk.bf16.gmra.mxu1 %vm610_vm2, %v1398_v23  ;;  %1182 = vst.msk [vmem:[%s1919_s19 + $0x4] sm:$0xf] %vm1180_vm3, %v1117_v32  ;;  %v729_v37 = vadd.f32 %v1906_v2, %v728_v35  ;;  %1630 = vmatmul.msk.bf16.gmra.mxu3 %vm610_vm2, %v1534_v31  ;;  %v1411_v23 = vld [vmem:[%s1790_s28 + $0xc8] sm:$0xf0]  ;;  %v1401_v31 = vld [vmem:[%s1790_s28 + $0xb0] sm:$0xf] }
  0xba   : > { %v1414_v30 = vor.u32 %v1662_v22, %v1411_v23  ;;  %v1661_v32 = vld [vmem:[%s1790_s28 + $0xb4] sm:$0xf0] }
  0xbb   : > { %v898_v38 = vadd.f32 %v897_v1, %v729_v37  ;;  %767 = vmatmul.bf16.gmra.mxu0 %v1386_v34  ;;  %847 = vmatmul.bf16.gmra.mxu2 %v1514_v36  ;;  %v1529_v37 = vld [vmem:[%s1790_s28 + $0x1b0] sm:$0xf] }
  0xbc   : > { %v1943_v39 = vpop.f32.mrf.mxu3 }
  0xbd   : > { %v1054_v40 = vmax.f32 %v898_v38, 0.0  ;;  %v1693_v38 = vld [vmem:[%s1790_s28 + $0x1b4] sm:$0xf0] }
  0xbe   : > { %v904_v41 = vpop.f32.mrf.mxu1  ;;  %v808_v43 = vpop.f32.mrf.mxu2 }
  0xbf   : > { %v1118_v42 = vpack.c.bf16 %v1054_v40, %v1054_v40  ;;  %v809_v44 = vadd.f32 %v1906_v2, %v808_v43 }
  0xc0   : > { %v730_v45 = vpop.f32.mrf.mxu0 }
  0xc1   : > { %1183 = vst.msk [vmem:[%s1919_s19 + $0x8] sm:$0xf] %vm1180_vm3, %v1118_v42  ;;  %v731_v46 = vadd.f32 %v1906_v2, %v730_v45  ;;  %v978_v49 = vadd.f32 %v1893_v55, %v809_v44  ;;  %v1394_v55 = vor.u32 %v1659_v57, %v1393_v56 }
  0xc3   : > { %v900_v50 = vadd.f32 %v899_v13, %v731_v46  ;;  %v1086_v53 = vmax.f32 %v978_v49, 0.0  ;;  %v1530_v46 = vor.u32 %v1693_v38, %v1529_v37  ;;  %v1666_v37 = vld [vmem:[%s1790_s28 + $0xe4] sm:$0xf]  ;;  %v1427_v38 = vld [vmem:[%s1790_s28 + $0xe8] sm:$0xf0] }
  0xc4   : > { %v1956_v58 = vpop.f32.mrf.mxu3 }
  0xc5   : > { %v1055_v59 = vmax.f32 %v900_v50, 0.0  ;;  %v1150_v1 = vpack.c.bf16 %v1086_v53, %v1086_v53 }
  0xc6   : > { %v907_v60 = vpop.f32.mrf.mxu1  ;;  %v810_v4 = vpop.f32.mrf.mxu2 }
  0xc7   : > { %v1119_v3 = vpack.c.bf16 %v1055_v59, %v1055_v59  ;;  %1215 = vst.msk [vmem:[%s1919_s19 + $0x88] sm:$0xf] %vm1180_vm3, %v1150_v1  ;;  %v811_v5 = vadd.f32 %v1906_v2, %v810_v4  ;;  %v1555_v4 = vld [vmem:[%s1790_s28 + $0x1e8] sm:$0xf0] }
  0xc8   : > { %v733_v6 = vpop.f32.mrf.mxu0 }
  0xc9   : > { %1614 = vmatmul.msk.bf16.gmra.mxu1 %vm610_vm2, %v1406_v54  ;;  %1184 = vst.msk [vmem:[%s1919_s19 + $0xc] sm:$0xf] %vm1180_vm3, %v1119_v3  ;;  %v734_v8 = vadd.f32 %v1906_v2, %v733_v6  ;;  %1631 = vmatmul.msk.bf16.gmra.mxu3 %vm610_vm2, %v1542_v63  ;;  %v980_v9 = vadd.f32 %v1901_v0, %v811_v5  ;;  %v1698_v3 = vld [vmem:[%s1790_s28 + $0x1e4] sm:$0xf]  ;;  %v1409_v6 = vld [vmem:[%s1790_s28 + $0xc0] sm:$0xf] }
  0xca   : > { %v1422_v5 = vor.u32 %v1664_v61, %v1419_v62 }
  0xcb   : > { %v903_v10 = vadd.f32 %v902_v28, %v734_v8  ;;  %772 = vmatmul.bf16.gmra.mxu0 %v1394_v55  ;;  %v1087_v12 = vmax.f32 %v980_v9, 0.0  ;;  %852 = vmatmul.bf16.gmra.mxu2 %v1522_v7  ;;  %v1547_v28 = vld [vmem:[%s1790_s28 + $0x1d8] sm:$0xf0]  ;;  %v1663_v7 = vld [vmem:[%s1790_s28 + $0xc4] sm:$0xf0] }
  0xcc   : > { %v1969_v13 = vpop.f32.mrf.mxu3  ;;  %v1550_v40 = vor.u32 %v1696_v27, %v1547_v28 }
  0xcd   : > { %v1056_v14 = vmax.f32 %v903_v10, 0.0  ;;  %v1151_v17 = vpack.c.bf16 %v1087_v12, %v1087_v12  ;;  %v1537_v12 = vld [vmem:[%s1790_s28 + $0x1c0] sm:$0xf] }
  0xce   : > { %v909_v16 = vpop.f32.mrf.mxu1  ;;  %v813_v19 = vpop.f32.mrf.mxu2 }
  0xcf   : > { %v1120_v18 = vpack.c.bf16 %v1056_v14, %v1056_v14  ;;  %1216 = vst.msk [vmem:[%s1919_s19 + $0x8c] sm:$0xf] %vm1180_vm3, %v1151_v17  ;;  %v814_v0 = vadd.f32 %v1906_v2, %v813_v19  ;;  %v1695_v14 = vld [vmem:[%s1790_s28 + $0x1c4] sm:$0xf0]  ;;  %v1558_v17 = vor.u32 %v1698_v3, %v1555_v4 }
  0xd0   : > { %v735_v20 = vpop.f32.mrf.mxu0 }
  0xd1   : > { %1185 = vst.msk [vmem:[%s1919_s19 + $0x10] sm:$0xf] %vm1180_vm3, %v1120_v18  ;;  %v736_v21 = vadd.f32 %v1906_v2, %v735_v20  ;;  %v983_v24 = vadd.f32 %v1914_v11, %v814_v0  ;;  %v1402_v11 = vor.u32 %v1661_v32, %v1401_v31 }
  0xd3   : > { %v905_v25 = vadd.f32 %v904_v41, %v736_v21  ;;  %v1088_v29 = vmax.f32 %v983_v24, 0.0  ;;  %v1538_v21 = vor.u32 %v1695_v14, %v1537_v12  ;;  %v1668_v12 = vld [vmem:[%s1790_s28 + $0xf4] sm:$0xf]  ;;  %v1435_v14 = vld [vmem:[%s1790_s28 + $0xf8] sm:$0xf0] }
  0xd4   : > { %v1984_v34 = vpop.f32.mrf.mxu3 }
  0xd5   : > { %v1057_v35 = vmax.f32 %v905_v25, 0.0  ;;  %v1152_v42 = vpack.c.bf16 %v1088_v29, %v1088_v29 }
  0xd6   : > { %v912_v36 = vpop.f32.mrf.mxu1  ;;  %v815_v44 = vpop.f32.mrf.mxu2 }
  0xd7   : > { %v1121_v43 = vpack.c.bf16 %v1057_v35, %v1057_v35  ;;  %1217 = vst.msk [vmem:[%s1919_s19 + $0x90] sm:$0xf] %vm1180_vm3, %v1152_v42  ;;  %v816_v41 = vadd.f32 %v1906_v2, %v815_v44  ;;  %v1563_v44 = vld [vmem:[%s1790_s28 + $0x1f8] sm:$0xf0] }
  0xd8   : > { %v738_v45 = vpop.f32.mrf.mxu0 }
  0xd9   : > { %1615 = vmatmul.msk.bf16.gmra.mxu1 %vm610_vm2, %v1414_v30  ;;  %1186 = vst.msk [vmem:[%s1919_s19 + $0x14] sm:$0xf] %vm1180_vm3, %v1121_v43  ;;  %v739_v47 = vadd.f32 %v1906_v2, %v738_v45  ;;  %1632 = vmatmul.msk.bf16.gmra.mxu3 %vm610_vm2, %v1550_v40  ;;  %v985_v48 = vadd.f32 %v1932_v26, %v816_v41  ;;  %v1700_v43 = vld [vmem:[%s1790_s28 + $0x1f4] sm:$0xf]  ;;  %v1417_v45 = vld [vmem:[%s1790_s28 + $0xd0] sm:$0xf] }
  0xda   : > { %v1430_v41 = vor.u32 %v1666_v37, %v1427_v38 }
  0xdb   : > { %v908_v49 = vadd.f32 %v907_v60, %v739_v47  ;;  %777 = vmatmul.bf16.gmra.mxu0 %v1402_v11  ;;  %v1089_v50 = vmax.f32 %v985_v48, 0.0  ;;  %857 = vmatmul.bf16.gmra.mxu2 %v1530_v46  ;;  %v1665_v46 = vld [vmem:[%s1790_s28 + $0xd4] sm:$0xf0] }
  0xdc   : > { %v1997_v51 = vpop.f32.mrf.mxu3 }
  0xdd   : > { %v1058_v52 = vmax.f32 %v908_v49, 0.0  ;;  %v1153_v54 = vpack.c.bf16 %v1089_v50, %v1089_v50  ;;  %v1545_v49 = vld [vmem:[%s1790_s28 + $0x1d0] sm:$0xf]  ;;  %v1697_v50 = vld [vmem:[%s1790_s28 + $0x1d4] sm:$0xf0] }
  0xde   : > { %v914_v53 = vpop.f32.mrf.mxu1  ;;  %v818_v57 = vpop.f32.mrf.mxu2 }
  0xdf   : > { %v1122_v56 = vpack.c.bf16 %v1058_v52, %v1058_v52  ;;  %1218 = vst.msk [vmem:[%s1919_s19 + $0x94] sm:$0xf] %vm1180_vm3, %v1153_v54  ;;  %v819_v26 = vadd.f32 %v1906_v2, %v818_v57  ;;  %v1566_v54 = vor.u32 %v1700_v43, %v1563_v44 }
  0xe0   : > { %v740_v59 = vpop.f32.mrf.mxu0 }
  0xe1   : > { %1187 = vst.msk [vmem:[%s1919_s19 + $0x18] sm:$0xf] %vm1180_vm3, %v1122_v56  ;;  %v741_v60 = vadd.f32 %v1906_v2, %v740_v59  ;;  %v988_v63 = vadd.f32 %v1943_v39, %v819_v26  ;;  %v1410_v39 = vor.u32 %v1663_v7, %v1409_v6 }
  0xe3   : > { %v910_v1 = vadd.f32 %v909_v16, %v741_v60  ;;  %v1090_v55 = vmax.f32 %v988_v63, 0.0  ;;  %v1546_v60 = vor.u32 %v1697_v50, %v1545_v49 }
  0xe4   : > { %v2012_v8 = vpop.f32.mrf.mxu3 }
  0xe5   : > { %v1059_v9 = vmax.f32 %v910_v1, 0.0  ;;  %v1154_v18 = vpack.c.bf16 %v1090_v55, %v1090_v55 }
  0xe6   : > { %v917_v10 = vpop.f32.mrf.mxu1  ;;  %v820_v0 = vpop.f32.mrf.mxu2 }
  0xe7   : > { %v1123_v19 = vpack.c.bf16 %v1059_v9, %v1059_v9  ;;  %1219 = vst.msk [vmem:[%s1919_s19 + $0x98] sm:$0xf] %vm1180_vm3, %v1154_v18  ;;  %v821_v16 = vadd.f32 %v1906_v2, %v820_v0  ;;  %v1438_v0 = vor.u32 %v1668_v12, %v1435_v14 }
  0xe8   : > { %v743_v20 = vpop.f32.mrf.mxu0 }
  0xe9   : > { %1616 = vmatmul.msk.bf16.gmra.mxu1 %vm610_vm2, %v1422_v5  ;;  %1188 = vst.msk [vmem:[%s1919_s19 + $0x1c] sm:$0xf] %vm1180_vm3, %v1123_v19  ;;  %v744_v22 = vadd.f32 %v1906_v2, %v743_v20  ;;  %1633 = vmatmul.msk.bf16.gmra.mxu3 %vm610_vm2, %v1558_v17  ;;  %v990_v23 = vadd.f32 %v1956_v58, %v821_v16  ;;  %v1667_v16 = vld [vmem:[%s1790_s28 + $0xe4] sm:$0xf0] }
  0xeb   : > { %v913_v24 = vadd.f32 %v912_v36, %v744_v22  ;;  %782 = vmatmul.bf16.gmra.mxu0 %v1410_v39  ;;  %v1091_v25 = vmax.f32 %v990_v23, 0.0  ;;  %862 = vmatmul.bf16.gmra.mxu2 %v1538_v21  ;;  %v1425_v39 = vld [vmem:[%s1790_s28 + $0xe0] sm:$0xf]  ;;  %v1699_v23 = vld [vmem:[%s1790_s28 + $0x1e4] sm:$0xf0] }
  0xec   : > { %v2025_v27 = vpop.f32.mrf.mxu3  ;;  %v1553_v22 = vld [vmem:[%s1790_s28 + $0x1e0] sm:$0xf] }
  0xed   : > { %v1060_v28 = vmax.f32 %v913_v24, 0.0  ;;  %v1155_v30 = vpack.c.bf16 %v1091_v25, %v1091_v25 }
  0xee   : > { %v919_v29 = vpop.f32.mrf.mxu1  ;;  %v823_v32 = vpop.f32.mrf.mxu2 }
  0xef   : > { %v1124_v31 = vpack.c.bf16 %v1060_v28, %v1060_v28  ;;  %1220 = vst.msk [vmem:[%s1919_s19 + $0x9c] sm:$0xf] %vm1180_vm3, %v1155_v30  ;;  %v824_v58 = vadd.f32 %v1906_v2, %v823_v32  ;;  %v1426_v30 = vor.u32 %v1667_v16, %v1425_v39 }
  0xf0   : > { %v745_v35 = vpop.f32.mrf.mxu0 }
  0xf1   : > { %1189 = vst.msk [vmem:[%s1919_s19 + $0x20] sm:$0xf] %vm1180_vm3, %v1124_v31  ;;  %v746_v36 = vadd.f32 %v1906_v2, %v745_v35  ;;  %v993_v40 = vadd.f32 %v1969_v13, %v824_v58  ;;  %v1418_v13 = vor.u32 %v1665_v46, %v1417_v45  ;;  %v1670_v45 = vld [vmem:[%s1790_s28 + $0x104] sm:$0xf]  ;;  %v1443_v46 = vld [vmem:[%s1790_s28 + $0x108] sm:$0xf0] }
  0xf3   : > { %v915_v42 = vadd.f32 %v914_v53, %v746_v36  ;;  %v1092_v11 = vmax.f32 %v993_v40, 0.0 }
  0xf4   : > { %v2042_v52 = vpop.f32.mrf.mxu3 }
  0xf5   : > { %v1061_v47 = vmax.f32 %v915_v42, 0.0  ;;  %v1156_v56 = vpack.c.bf16 %v1092_v11, %v1092_v11 }
  0xf6   : > { %v922_v48 = vpop.f32.mrf.mxu1  ;;  %v825_v26 = vpop.f32.mrf.mxu2 }
  0xf7   : > { %v1125_v57 = vpack.c.bf16 %v1061_v47, %v1061_v47  ;;  %1221 = vst.msk [vmem:[%s1919_s19 + $0xa0] sm:$0xf] %vm1180_vm3, %v1156_v56  ;;  %v826_v53 = vadd.f32 %v1906_v2, %v825_v26  ;;  %v1433_v56 = vld [vmem:[%s1790_s28 + $0xf0] sm:$0xf] }
  0xf8   : > { %v748_v59 = vpop.f32.mrf.mxu0 }
  0xf9   : > { %1617 = vmatmul.msk.bf16.gmra.mxu1 %vm610_vm2, %v1430_v41  ;;  %1190 = vst.msk [vmem:[%s1919_s19 + $0x24] sm:$0xf] %vm1180_vm3, %v1125_v57  ;;  %v749_v61 = vadd.f32 %v1906_v2, %v748_v59  ;;  %1634 = vmatmul.msk.bf16.gmra.mxu3 %vm610_vm2, %v1566_v54  ;;  %v995_v62 = vadd.f32 %v1984_v34, %v826_v53  ;;  %v1669_v57 = vld [vmem:[%s1790_s28 + $0xf4] sm:$0xf0]  ;;  %v1561_v53 = vld [vmem:[%s1790_s28 + $0x1f0] sm:$0xf] }
  0xfa   : > { %v1446_v54 = vor.u32 %v1670_v45, %v1443_v46  ;;  %v1701_v59 = vld [vmem:[%s1790_s28 + $0x1f4] sm:$0xf0] }
  0xfb   : > { %v918_v63 = vadd.f32 %v917_v10, %v749_v61  ;;  %787 = vmatmul.bf16.gmra.mxu0 %v1418_v13  ;;  %v1093_v1 = vmax.f32 %v995_v62, 0.0  ;;  %867 = vmatmul.bf16.gmra.mxu2 %v1546_v60 }
  0xfc   : > { %v2053_v7 = vpop.f32.mrf.mxu3 }
  0xfd   : > { %v1062_v3 = vmax.f32 %v918_v63, 0.0  ;;  %v1157_v55 = vpack.c.bf16 %v1093_v1, %v1093_v1  ;;  %v1434_v63 = vor.u32 %v1669_v57, %v1433_v56 }
  0xfe   : > { %v924_v4 = vpop.f32.mrf.mxu1  ;;  %v828_v6 = vpop.f32.mrf.mxu2 }
  0xff   : > { %v1126_v5 = vpack.c.bf16 %v1062_v3, %v1062_v3  ;;  %1222 = vst.msk [vmem:[%s1919_s19 + $0xa4] sm:$0xf] %vm1180_vm3, %v1157_v55  ;;  %v829_v34 = vadd.f32 %v1906_v2, %v828_v6  ;;  %v1562_v3 = vor.u32 %v1701_v59, %v1561_v53 }
 0x100   : > { %v750_v9 = vpop.f32.mrf.mxu0 }
 0x101   : > { %1191 = vst.msk [vmem:[%s1919_s19 + $0x28] sm:$0xf] %vm1180_vm3, %v1126_v5  ;;  %v751_v10 = vadd.f32 %v1906_v2, %v750_v9  ;;  %v998_v17 = vadd.f32 %v1997_v51, %v829_v34 }
 0x103   : > { %v920_v18 = vadd.f32 %v919_v29, %v751_v10  ;;  %v1094_v19 = vmax.f32 %v998_v17, 0.0  ;;  %v1554_v29 = vor.u32 %v1699_v23, %v1553_v22 }
 0x104   : > { %v2075_v58 = vpop.f32.mrf.mxu3 }
 0x105   : > { %v1063_v20 = vmax.f32 %v920_v18, 0.0  ;;  %v1158_v24 = vpack.c.bf16 %v1094_v19, %v1094_v19 }
 0x106   : > { %v927_v21 = vpop.f32.mrf.mxu1  ;;  %v830_v28 = vpop.f32.mrf.mxu2 }
 0x107   : > { %v1127_v25 = vpack.c.bf16 %v1063_v20, %v1063_v20  ;;  %1223 = vst.msk [vmem:[%s1919_s19 + $0xa8] sm:$0xf] %vm1180_vm3, %v1158_v24  ;;  %v831_v31 = vadd.f32 %v1906_v2, %v830_v28 }
 0x108   : > { %v753_v51 = vpop.f32.mrf.mxu0 }
 0x109   : > { %1618 = vmatmul.msk.bf16.gmra.mxu1 %vm610_vm2, %v1438_v0  ;;  %1192 = vst.msk [vmem:[%s1919_s19 + $0x2c] sm:$0xf] %vm1180_vm3, %v1127_v25  ;;  %v754_v32 = vadd.f32 %v1906_v2, %v753_v51  ;;  %v1000_v35 = vadd.f32 %v2012_v8, %v831_v31 }
 0x10b   : > { %v923_v36 = vadd.f32 %v922_v48, %v754_v32  ;;  %792 = vmatmul.bf16.gmra.mxu0 %v1426_v30  ;;  %v1095_v37 = vmax.f32 %v1000_v35, 0.0  ;;  %872 = vmatmul.bf16.gmra.mxu2 %v1554_v29 }
 0x10c   : > { %v2087_v49 = vpop.f32.mrf.mxu3 }
 0x10d   : > { %v1064_v38 = vmax.f32 %v923_v36, 0.0  ;;  %v1159_v42 = vpack.c.bf16 %v1095_v37, %v1095_v37 }
 0x10e   : > { %v929_v40 = vpop.f32.mrf.mxu1  ;;  %v833_v44 = vpop.f32.mrf.mxu2 }
 0x10f   : > { %v1128_v43 = vpack.c.bf16 %v1064_v38, %v1064_v38  ;;  %1224 = vst.msk [vmem:[%s1919_s19 + $0xac] sm:$0xf] %vm1180_vm3, %v1159_v42  ;;  %v834_v11 = vadd.f32 %v1906_v2, %v833_v44 }
 0x110   : > { %v755_v41 = vpop.f32.mrf.mxu0 }
 0x111   : > { %1193 = vst.msk [vmem:[%s1919_s19 + $0x30] sm:$0xf] %vm1180_vm3, %v1128_v43  ;;  %v756_v8 = vadd.f32 %v1906_v2, %v755_v41  ;;  %v1003_v47 = vadd.f32 %v2025_v27, %v834_v11 }
 0x113   : > { %v925_v48 = vadd.f32 %v924_v4, %v756_v8  ;;  %v1096_v50 = vmax.f32 %v1003_v47, 0.0 }
 0x114   : > { %v1014_v10 = vpop.f32.mrf.mxu3 }
 0x115   : > { %v1065_v26 = vmax.f32 %v925_v48, 0.0  ;;  %v1160_v60 = vpack.c.bf16 %v1096_v50, %v1096_v50 }
 0x116   : > { %v932_v13 = vpop.f32.mrf.mxu1  ;;  %v835_v62 = vpop.f32.mrf.mxu2 }
 0x117   : > { %v1129_v61 = vpack.c.bf16 %v1065_v26, %v1065_v26  ;;  %1225 = vst.msk [vmem:[%s1919_s19 + $0xb0] sm:$0xf] %vm1180_vm3, %v1160_v60  ;;  %v836_v27 = vadd.f32 %v1906_v2, %v835_v62 }
 0x118   : > { %v758_v1 = vpop.f32.mrf.mxu0 }
 0x119   : > { %1619 = vmatmul.msk.bf16.gmra.mxu1 %vm610_vm2, %v1446_v54  ;;  %1194 = vst.msk [vmem:[%s1919_s19 + $0x34] sm:$0xf] %vm1180_vm3, %v1129_v61  ;;  %v759_v4 = vadd.f32 %v1906_v2, %v758_v1  ;;  %v1005_v55 = vadd.f32 %v2042_v52, %v836_v27 }
 0x11b   : > { %v928_v5 = vadd.f32 %v927_v21, %v759_v4  ;;  %797 = vmatmul.bf16.gmra.mxu0 %v1434_v63  ;;  %v1097_v6 = vmax.f32 %v1005_v55, 0.0  ;;  %877 = vmatmul.bf16.gmra.mxu2 %v1562_v3 }
 0x11c   : > { %v1017_v25 = vpop.f32.mrf.mxu3 }
 0x11d   : > { %v1066_v34 = vmax.f32 %v928_v5, 0.0  ;;  %v1161_v12 = vpack.c.bf16 %v1097_v6, %v1097_v6 }
 0x11e   : > { %v934_v9 = vpop.f32.mrf.mxu1  ;;  %v838_v17 = vpop.f32.mrf.mxu2 }
 0x11f   : > { %v1130_v14 = vpack.c.bf16 %v1066_v34, %v1066_v34  ;;  %1226 = vst.msk [vmem:[%s1919_s19 + $0xb4] sm:$0xf] %vm1180_vm3, %v1161_v12  ;;  %v839_v18 = vadd.f32 %v1906_v2, %v838_v17 }
 0x120   : > { %v760_v19 = vpop.f32.mrf.mxu0 }
 0x121   : > { %1195 = vst.msk [vmem:[%s1919_s19 + $0x38] sm:$0xf] %vm1180_vm3, %v1130_v14  ;;  %v761_v52 = vadd.f32 %v1906_v2, %v760_v19  ;;  %v1008_v0 = vadd.f32 %v2053_v7, %v839_v18 }
 0x123   : > { %v930_v39 = vadd.f32 %v929_v40, %v761_v52  ;;  %v1098_v16 = vmax.f32 %v1008_v0, 0.0 }
 0x124   : > { %v1019_v44 = vpop.f32.mrf.mxu3 }
 0x125   : > { %v1067_v20 = vmax.f32 %v930_v39, 0.0  ;;  %v1162_v22 = vpack.c.bf16 %v1098_v16, %v1098_v16 }
 0x126   : > { %v937_v21 = vpop.f32.mrf.mxu1  ;;  %v840_v24 = vpop.f32.mrf.mxu2 }
 0x127   : > { %v1131_v23 = vpack.c.bf16 %v1067_v20, %v1067_v20  ;;  %1227 = vst.msk [vmem:[%s1919_s19 + $0xb8] sm:$0xf] %vm1180_vm3, %v1162_v22  ;;  %v841_v28 = vadd.f32 %v1906_v2, %v840_v24 }
 0x128   : > { %v763_v30 = vpop.f32.mrf.mxu0 }
 0x129   : > { %1196 = vst.msk [vmem:[%s1919_s19 + $0x3c] sm:$0xf] %vm1180_vm3, %v1131_v23  ;;  %v764_v31 = vadd.f32 %v1906_v2, %v763_v30  ;;  %v1010_v7 = vadd.f32 %v2075_v58, %v841_v28 }
 0x12b   : > { %v933_v51 = vadd.f32 %v932_v13, %v764_v31  ;;  %v1099_v29 = vmax.f32 %v1010_v7, 0.0 }
 0x12c   : > { %v1022_v26 = vpop.f32.mrf.mxu3 }
 0x12d   : > { %v1068_v32 = vmax.f32 %v933_v51, 0.0  ;;  %v1163_v36 = vpack.c.bf16 %v1099_v29, %v1099_v29 }
 0x12e   : > { %v939_v35 = vpop.f32.mrf.mxu1  ;;  %v843_v38 = vpop.f32.mrf.mxu2 }
 0x12f   : > { %v1132_v37 = vpack.c.bf16 %v1068_v32, %v1068_v32  ;;  %1228 = vst.msk [vmem:[%s1919_s19 + $0xbc] sm:$0xf] %vm1180_vm3, %v1163_v36  ;;  %v844_v40 = vadd.f32 %v1906_v2, %v843_v38 }
 0x130   : > { %v765_v42 = vpop.f32.mrf.mxu0 }
 0x131   : > { %1197 = vst.msk [vmem:[%s1919_s19 + $0x40] sm:$0xf] %vm1180_vm3, %v1132_v37  ;;  %v766_v43 = vadd.f32 %v1906_v2, %v765_v42  ;;  %v1013_v58 = vadd.f32 %v2087_v49, %v844_v40 }
 0x133   : > { %v935_v11 = vadd.f32 %v934_v9, %v766_v43  ;;  %v1100_v41 = vmax.f32 %v1013_v58, 0.0 }
 0x134   : > { %v1024_v34 = vpop.f32.mrf.mxu3 }
 0x135   : > { %v1069_v8 = vmax.f32 %v935_v11, 0.0  ;;  %v1164_v46 = vpack.c.bf16 %v1100_v41, %v1100_v41 }
 0x136   : > { %v942_v45 = vpop.f32.mrf.mxu1  ;;  %v845_v48 = vpop.f32.mrf.mxu2 }
 0x137   : > { %v1133_v47 = vpack.c.bf16 %v1069_v8, %v1069_v8  ;;  %1229 = vst.msk [vmem:[%s1919_s19 + $0xc0] sm:$0xf] %vm1180_vm3, %v1164_v46  ;;  %v846_v50 = vadd.f32 %v1906_v2, %v845_v48 }
 0x138   : > { %v768_v54 = vpop.f32.mrf.mxu0 }
 0x139   : > { %1198 = vst.msk [vmem:[%s1919_s19 + $0x44] sm:$0xf] %vm1180_vm3, %v1133_v47  ;;  %v769_v56 = vadd.f32 %v1906_v2, %v768_v54  ;;  %v1015_v57 = vadd.f32 %v1014_v10, %v846_v50 }
 0x13b   : > { %v938_v49 = vadd.f32 %v937_v21, %v769_v56  ;;  %v1101_v13 = vmax.f32 %v1015_v57, 0.0 }
 0x13c   : > { %v1027_v23 = vpop.f32.mrf.mxu3 }
 0x13d   : > { %v1070_v53 = vmax.f32 %v938_v49, 0.0  ;;  %v1165_v60 = vpack.c.bf16 %v1101_v13, %v1101_v13 }
 0x13e   : > { %v944_v59 = vpop.f32.mrf.mxu1  ;;  %v848_v62 = vpop.f32.mrf.mxu2 }
 0x13f   : > { %v1134_v61 = vpack.c.bf16 %v1070_v53, %v1070_v53  ;;  %1230 = vst.msk [vmem:[%s1919_s19 + $0xc4] sm:$0xf] %vm1180_vm3, %v1165_v60  ;;  %v849_v63 = vadd.f32 %v1906_v2, %v848_v62 }
 0x140   : > { %v770_v27 = vpop.f32.mrf.mxu0 }
 0x141   : > { %1199 = vst.msk [vmem:[%s1919_s19 + $0x48] sm:$0xf] %vm1180_vm3, %v1134_v61  ;;  %v771_v1 = vadd.f32 %v1906_v2, %v770_v27  ;;  %v1018_v3 = vadd.f32 %v1017_v25, %v849_v63 }
 0x143   : > { %v940_v4 = vadd.f32 %v939_v35, %v771_v1  ;;  %v1102_v55 = vmax.f32 %v1018_v3, 0.0 }
 0x144   : > { %v1029_v42 = vpop.f32.mrf.mxu3 }
 0x145   : > { %v1071_v5 = vmax.f32 %v940_v4, 0.0  ;;  %v1166_v9 = vpack.c.bf16 %v1102_v55, %v1102_v55 }
 0x146   : > { %v947_v6 = vpop.f32.mrf.mxu1  ;;  %v850_v12 = vpop.f32.mrf.mxu2 }
 0x147   : > { %v1135_v10 = vpack.c.bf16 %v1071_v5, %v1071_v5  ;;  %1231 = vst.msk [vmem:[%s1919_s19 + $0xc8] sm:$0xf] %vm1180_vm3, %v1166_v9  ;;  %v851_v14 = vadd.f32 %v1906_v2, %v850_v12 }
 0x148   : > { %v773_v17 = vpop.f32.mrf.mxu0 }
 0x149   : > { %1200 = vst.msk [vmem:[%s1919_s19 + $0x4c] sm:$0xf] %vm1180_vm3, %v1135_v10  ;;  %v774_v18 = vadd.f32 %v1906_v2, %v773_v17  ;;  %v1020_v19 = vadd.f32 %v1019_v44, %v851_v14 }
 0x14b   : > { %v943_v52 = vadd.f32 %v942_v45, %v774_v18  ;;  %v1103_v0 = vmax.f32 %v1020_v19, 0.0 }
 0x14c   : > { %v1032_v57 = vpop.f32.mrf.mxu3 }
 0x14d   : > { %v1072_v39 = vmax.f32 %v943_v52, 0.0  ;;  %v1167_v20 = vpack.c.bf16 %v1103_v0, %v1103_v0 }
 0x14e   : > { %v949_v16 = vpop.f32.mrf.mxu1  ;;  %v853_v22 = vpop.f32.mrf.mxu2 }
 0x14f   : > { %v1136_v21 = vpack.c.bf16 %v1072_v39, %v1072_v39  ;;  %1232 = vst.msk [vmem:[%s1919_s19 + $0xcc] sm:$0xf] %vm1180_vm3, %v1167_v20  ;;  %v854_v24 = vadd.f32 %v1906_v2, %v853_v22 }
 0x150   : > { %v775_v25 = vpop.f32.mrf.mxu0 }
 0x151   : > { %1201 = vst.msk [vmem:[%s1919_s19 + $0x50] sm:$0xf] %vm1180_vm3, %v1136_v21  ;;  %v776_v28 = vadd.f32 %v1906_v2, %v775_v25  ;;  %v1023_v30 = vadd.f32 %v1022_v26, %v854_v24 }
 0x153   : > { %v945_v31 = vadd.f32 %v944_v59, %v776_v28  ;;  %v1104_v7 = vmax.f32 %v1023_v30, 0.0 }
 0x154   : > { %v1034_v5 = vpop.f32.mrf.mxu3 }
 0x155   : > { %v1073_v51 = vmax.f32 %v945_v31, 0.0  ;;  %v1168_v32 = vpack.c.bf16 %v1104_v7, %v1104_v7 }
 0x156   : > { %v952_v29 = vpop.f32.mrf.mxu1  ;;  %v855_v36 = vpop.f32.mrf.mxu2 }
 0x157   : > { %v1137_v35 = vpack.c.bf16 %v1073_v51, %v1073_v51  ;;  %1233 = vst.msk [vmem:[%s1919_s19 + $0xd0] sm:$0xf] %vm1180_vm3, %v1168_v32  ;;  %v856_v37 = vadd.f32 %v1906_v2, %v855_v36 }
 0x158   : > { %v778_v38 = vpop.f32.mrf.mxu0 }
 0x159   : > { %1202 = vst.msk [vmem:[%s1919_s19 + $0x54] sm:$0xf] %vm1180_vm3, %v1137_v35  ;;  %v779_v40 = vadd.f32 %v1906_v2, %v778_v38  ;;  %v1025_v43 = vadd.f32 %v1024_v34, %v856_v37 }
 0x15b   : > { %v948_v44 = vadd.f32 %v947_v6, %v779_v40  ;;  %v1105_v58 = vmax.f32 %v1025_v43, 0.0 }
 0x15c   : > { %v1037_v21 = vpop.f32.mrf.mxu3 }
 0x15d   : > { %v1074_v11 = vmax.f32 %v948_v44, 0.0  ;;  %v1169_v8 = vpack.c.bf16 %v1105_v58, %v1105_v58 }
 0x15e   : > { %v954_v41 = vpop.f32.mrf.mxu1  ;;  %v858_v46 = vpop.f32.mrf.mxu2 }
 0x15f   : > { %v1138_v45 = vpack.c.bf16 %v1074_v11, %v1074_v11  ;;  %1234 = vst.msk [vmem:[%s1919_s19 + $0xd4] sm:$0xf] %vm1180_vm3, %v1169_v8  ;;  %v859_v47 = vadd.f32 %v1906_v2, %v858_v46 }
 0x160   : > { %v780_v48 = vpop.f32.mrf.mxu0 }
 0x161   : > { %1203 = vst.msk [vmem:[%s1919_s19 + $0x58] sm:$0xf] %vm1180_vm3, %v1138_v45  ;;  %v781_v50 = vadd.f32 %v1906_v2, %v780_v48  ;;  %v1028_v54 = vadd.f32 %v1027_v23, %v859_v47 }
 0x163   : > { %v950_v56 = vadd.f32 %v949_v16, %v781_v50  ;;  %v1106_v49 = vmax.f32 %v1028_v54, 0.0 }
 0x164   : > { %v1039_v38 = vpop.f32.mrf.mxu3 }
 0x165   : > { %v1075_v26 = vmax.f32 %v950_v56, 0.0  ;;  %v1170_v53 = vpack.c.bf16 %v1106_v49, %v1106_v49 }
 0x166   : > { %v957_v13 = vpop.f32.mrf.mxu1  ;;  %v860_v60 = vpop.f32.mrf.mxu2 }
 0x167   : > { %v1139_v59 = vpack.c.bf16 %v1075_v26, %v1075_v26  ;;  %1235 = vst.msk [vmem:[%s1919_s19 + $0xd8] sm:$0xf] %vm1180_vm3, %v1170_v53  ;;  %v861_v61 = vadd.f32 %v1906_v2, %v860_v60 }
 0x168   : > { %v783_v62 = vpop.f32.mrf.mxu0 }
 0x169   : > { %1204 = vst.msk [vmem:[%s1919_s19 + $0x5c] sm:$0xf] %vm1180_vm3, %v1139_v59  ;;  %v784_v63 = vadd.f32 %v1906_v2, %v783_v62  ;;  %v1030_v27 = vadd.f32 %v1029_v42, %v861_v61 }
 0x16b   : > { %v953_v1 = vadd.f32 %v952_v29, %v784_v63  ;;  %v1107_v3 = vmax.f32 %v1030_v27, 0.0  ;;  %v804_v27 = vadd.f32 %v1906_v2, %v1921_v15 }
 0x16c   : > { %v1042_v54 = vpop.f32.mrf.mxu3 }
 0x16d   : > { %v1076_v4 = vmax.f32 %v953_v1, 0.0  ;;  %v1171_v6 = vpack.c.bf16 %v1107_v3, %v1107_v3 }
 0x16e   : > { %v959_v55 = vpop.f32.mrf.mxu1  ;;  %v863_v9 = vpop.f32.mrf.mxu2 }
 0x16f   : > { %v1140_v34 = vpack.c.bf16 %v1076_v4, %v1076_v4  ;;  %1236 = vst.msk [vmem:[%s1919_s19 + $0xdc] sm:$0xf] %vm1180_vm3, %v1171_v6  ;;  %v864_v10 = vadd.f32 %v1906_v2, %v863_v9 }
 0x170   : > { %v785_v12 = vpop.f32.mrf.mxu0 }
 0x171   : > { %1205 = vst.msk [vmem:[%s1919_s19 + $0x60] sm:$0xf] %vm1180_vm3, %v1140_v34  ;;  %v786_v14 = vadd.f32 %v1906_v2, %v785_v12  ;;  %v1033_v17 = vadd.f32 %v1032_v57, %v864_v10  ;;  %v1731_v12 = vld [vmem:[%s2223_s2] ss:$0 sm:$0xff] }
 0x173   : > { %v955_v18 = vadd.f32 %v954_v41, %v786_v14  ;;  %v1108_v19 = vmax.f32 %v1033_v17, 0.0 }
 0x174   : > { %v1044_v4 = vpop.f32.mrf.mxu3 }
 0x175   : > { %v1077_v52 = vmax.f32 %v955_v18, 0.0  ;;  %v1172_v39 = vpack.c.bf16 %v1108_v19, %v1108_v19 }
 0x176   : > { %v962_v0 = vpop.f32.mrf.mxu1  ;;  %v865_v20 = vpop.f32.mrf.mxu2 }
 0x177   : > { %v1141_v16 = vpack.c.bf16 %v1077_v52, %v1077_v52  ;;  %1237 = vst.msk [vmem:[%s1919_s19 + $0xe0] sm:$0xf] %vm1180_vm3, %v1172_v39  ;;  %v866_v22 = vadd.f32 %v1906_v2, %v865_v20  ;;  %v806_v52 = vadd.f32 %v1731_v12, %v1936_v33 }
 0x178   : > { %v788_v23 = vpop.f32.mrf.mxu0 }
 0x179   : > { %1206 = vst.msk [vmem:[%s1919_s19 + $0x64] sm:$0xf] %vm1180_vm3, %v1141_v16  ;;  %v789_v24 = vadd.f32 %v1906_v2, %v788_v23  ;;  %v1035_v25 = vadd.f32 %v1034_v5, %v866_v22 }
 0x17b   : > { %v958_v28 = vadd.f32 %v957_v13, %v789_v24  ;;  %v1109_v30 = vmax.f32 %v1035_v25, 0.0 }
 0x17c   : > { %v1047_v23 = vpop.f32.mrf.mxu3 }
 0x17d   : > { %v1078_v31 = vmax.f32 %v958_v28, 0.0  ;;  %v1173_v51 = vpack.c.bf16 %v1109_v30, %v1109_v30 }
 0x17e   : > { %v964_v7 = vpop.f32.mrf.mxu1  ;;  %v868_v32 = vpop.f32.mrf.mxu2 }
 0x17f   : > { %v1142_v29 = vpack.c.bf16 %v1078_v31, %v1078_v31  ;;  %1238 = vst.msk [vmem:[%s1919_s19 + $0xe4] sm:$0xf] %vm1180_vm3, %v1173_v51  ;;  %v869_v35 = vadd.f32 %v1906_v2, %v868_v32 }
 0x180   : > { %v790_v36 = vpop.f32.mrf.mxu0 }
 0x181   : > { %1207 = vst.msk [vmem:[%s1919_s19 + $0x68] sm:$0xf] %vm1180_vm3, %v1142_v29  ;;  %v791_v37 = vadd.f32 %v1906_v2, %v790_v36  ;;  %v1038_v40 = vadd.f32 %v1037_v21, %v869_v35 }
 0x183   : > { %v960_v42 = vadd.f32 %v959_v55, %v791_v37  ;;  %v1110_v43 = vmax.f32 %v1038_v40, 0.0 }
 0x184   : > { %v1049_v40 = vpop.f32.mrf.mxu3 }
 0x185   : > { %v1079_v44 = vmax.f32 %v960_v42, 0.0  ;;  %v1174_v11 = vpack.c.bf16 %v1110_v43, %v1110_v43 }
 0x186   : > { %v967_v58 = vpop.f32.mrf.mxu1  ;;  %v870_v8 = vpop.f32.mrf.mxu2 }
 0x187   : > { %v1143_v41 = vpack.c.bf16 %v1079_v44, %v1079_v44  ;;  %1239 = vst.msk [vmem:[%s1919_s19 + $0xe8] sm:$0xf] %vm1180_vm3, %v1174_v11  ;;  %v871_v45 = vadd.f32 %v1906_v2, %v870_v8 }
 0x188   : > { %v793_v46 = vpop.f32.mrf.mxu0 }
 0x189   : > { %1208 = vst.msk [vmem:[%s1919_s19 + $0x6c] sm:$0xf] %vm1180_vm3, %v1143_v41  ;;  %v794_v47 = vadd.f32 %v1906_v2, %v793_v46  ;;  %v1040_v48 = vadd.f32 %v1039_v38, %v871_v45 }
 0x18b   : > { %v963_v50 = vadd.f32 %v962_v0, %v794_v47  ;;  %v1111_v56 = vmax.f32 %v1040_v48, 0.0 }
 0x18d   : > { %v1080_v57 = vmax.f32 %v963_v50, 0.0  ;;  %v1175_v26 = vpack.c.bf16 %v1111_v56, %v1111_v56 }
 0x18e   : > { %v969_v49 = vpop.f32.mrf.mxu1  ;;  %v873_v53 = vpop.f32.mrf.mxu2 }
 0x18f   : > { %v1144_v13 = vpack.c.bf16 %v1080_v57, %v1080_v57  ;;  %1240 = vst.msk [vmem:[%s1919_s19 + $0xec] sm:$0xf] %vm1180_vm3, %v1175_v26  ;;  %v874_v59 = vadd.f32 %v1906_v2, %v873_v53 }
 0x190   : > { %v795_v60 = vpop.f32.mrf.mxu0 }
 0x191   : > { %1209 = vst.msk [vmem:[%s1919_s19 + $0x70] sm:$0xf] %vm1180_vm3, %v1144_v13  ;;  %v796_v61 = vadd.f32 %v1906_v2, %v795_v60  ;;  %v1043_v62 = vadd.f32 %v1042_v54, %v874_v59 }
 0x193   : > { %v965_v63 = vadd.f32 %v964_v7, %v796_v61  ;;  %v1112_v1 = vmax.f32 %v1043_v62, 0.0 }
 0x195   : > { %v1081_v3 = vmax.f32 %v965_v63, 0.0  ;;  %v1176_v5 = vpack.c.bf16 %v1112_v1, %v1112_v1 }
 0x196   : > { %v972_v55 = vpop.f32.mrf.mxu1  ;;  %v875_v9 = vpop.f32.mrf.mxu2 }
 0x197   : > { %v973_v6 = vadd.f32 %v972_v55, %v804_v27  ;;  %v1145_v34 = vpack.c.bf16 %v1081_v3, %v1081_v3  ;;  %1241 = vst.msk [vmem:[%s1919_s19 + $0xf0] sm:$0xf] %vm1180_vm3, %v1176_v5  ;;  %v876_v14 = vadd.f32 %v1731_v12, %v875_v9 }
 0x198   : > { %v798_v17 = vpop.f32.mrf.mxu0 }
 0x199   : > { %v1084_v10 = vmax.f32 %v973_v6, 0.0  ;;  %1210 = vst.msk [vmem:[%s1919_s19 + $0x74] sm:$0xf] %vm1180_vm3, %v1145_v34  ;;  %v799_v2 = vadd.f32 %v1731_v12, %v798_v17  ;;  %v1045_v18 = vadd.f32 %v1044_v4, %v876_v14 }
 0x19b   : > { %v1148_v15 = vpack.c.bf16 %v1084_v10, %v1084_v10  ;;  %v968_v19 = vadd.f32 %v967_v58, %v799_v2  ;;  %v1113_v0 = vmax.f32 %v1045_v18, 0.0 }
 0x19d   : > { %1213 = vst.msk [vmem:[%s1919_s19 + $0x80] sm:$0xf] %vm1180_vm3, %v1148_v15  ;;  %v1082_v39 = vmax.f32 %v968_v19, 0.0  ;;  %v1177_v20 = vpack.c.bf16 %v1113_v0, %v1113_v0 }
 0x19e   : > { %v974_v16 = vpop.f32.mrf.mxu1  ;;  %v878_v24 = vpop.f32.mrf.mxu2 }
 0x19f   : > { %v975_v21 = vadd.f32 %v974_v16, %v806_v52  ;;  %v1146_v22 = vpack.c.bf16 %v1082_v39, %v1082_v39  ;;  %1242 = vst.msk [vmem:[%s1919_s19 + $0xf4] sm:$0xf] %vm1180_vm3, %v1177_v20  ;;  %v879_v28 = vadd.f32 %v1731_v12, %v878_v24 }
 0x1a0   : > { %v800_v30 = vpop.f32.mrf.mxu0 }
 0x1a1   : > { %v1085_v25 = vmax.f32 %v975_v21, 0.0  ;;  %1211 = vst.msk [vmem:[%s1919_s19 + $0x78] sm:$0xf] %vm1180_vm3, %v1146_v22  ;;  %v801_v33 = vadd.f32 %v1731_v12, %v800_v30  ;;  %v1048_v7 = vadd.f32 %v1047_v23, %v879_v28 }
 0x1a3   : > { %v1149_v31 = vpack.c.bf16 %v1085_v25, %v1085_v25  ;;  %v970_v51 = vadd.f32 %v969_v49, %v801_v33  ;;  %v1114_v29 = vmax.f32 %v1048_v7, 0.0 }
 0x1a5   : > { %1214 = vst.msk [vmem:[%s1919_s19 + $0x84] sm:$0xf] %vm1180_vm3, %v1149_v31  ;;  %v1083_v32 = vmax.f32 %v970_v51, 0.0  ;;  %v1178_v35 = vpack.c.bf16 %v1114_v29, %v1114_v29 }
 0x1a6   : > { %v880_v37 = vpop.f32.mrf.mxu2 }
 0x1a7   : > { %v1147_v36 = vpack.c.bf16 %v1083_v32, %v1083_v32  ;;  %1243 = vst.msk [vmem:[%s1919_s19 + $0xf8] sm:$0xf] %vm1180_vm3, %v1178_v35  ;;  %v881_v38 = vadd.f32 %v1731_v12, %v880_v37 }
 0x1a9   : > { %1212 = vst.msk [vmem:[%s1919_s19 + $0x7c] sm:$0xf] %vm1180_vm3, %v1147_v36  ;;  %v1050_v42 = vadd.f32 %v1049_v40, %v881_v38 }
 0x1ab   : > { %v1115_v43 = vmax.f32 %v1050_v42, 0.0 }
 0x1ad   : > { %v1179_v44 = vpack.c.bf16 %v1115_v43, %v1115_v43 }
 0x1af   : > { %1244 = vst.msk [vmem:[%s1919_s19 + $0xfc] sm:$0xf] %vm1180_vm3, %v1179_v44 }
 0x1b0 PF: > { %s13_s12 = sadd.s32 1, %s1738_s12  }
 0x1b1   : > { %p10_p4 = scmp.ge.s32.totalorder %s13_s12, 34  }
 0x1b3   :  { %12 = sbr.rel (!%p10_p4) target bundleno = 1 (0x1), region = 62 }

</bundles_post_ra>
